<compile_context>
chip_gen: v7x
topology: tpu7x:2x2x1
jax: 0.10.0
libtpu: 0.0.40
codegen_flags: <defaults>
</compile_context>

<pallas_src>
import functools
import math

import jax
import jax.numpy as jnp
from jax.experimental import pallas as pl
from jax.experimental.pallas import tpu as pltpu


def _mhca_kernel(q_ref, kv_ref, wq_ref, wk_ref, wv_ref, wp_ref, b_ref, o_ref,
                 *, head, tb, n1, n2, dh, out_dim):
    # q_ref: (TB, N1, q_dim), kv_ref: (TB, N2, kv_dim)
    # wq_ref/wk_ref/wv_ref: (head, in_dim, dh)  (wq pre-scaled by 1/sqrt(dh))
    # wp_ref: (head, dh, out_dim), b_ref: (1, out_dim)
    q = q_ref[...]
    kv = kv_ref[...]
    q2 = q.reshape(tb * n1, q.shape[-1])       # (TB*N1, q_dim)  -- leading-dim merge only
    kv2 = kv.reshape(tb * n2, kv.shape[-1])    # (TB*N2, kv_dim)

    # Fused accumulator for the output projection (register-resident; small).
    acc = jnp.zeros((tb * n1, out_dim), jnp.float32)

    for h in range(head):                      # static, small head count
        # Per-head projections: head indexed on the leading axis (no lane slicing).
        qh = jnp.dot(q2, wq_ref[h], preferred_element_type=jnp.float32)    # (TB*N1, dh)
        kh = jnp.dot(kv2, wk_ref[h], preferred_element_type=jnp.float32)   # (TB*N2, dh)
        vh = jnp.dot(kv2, wv_ref[h], preferred_element_type=jnp.float32)   # (TB*N2, dh)

        qh3 = qh.reshape(tb, n1, dh)
        kh3 = kh.reshape(tb, n2, dh)
        vh3 = vh.reshape(tb, n2, dh)

        # Scores: contract last dims directly (no k.T); scale already in wq.
        s = jnp.einsum("bnd,bmd->bnm", qh3, kh3,
                       preferred_element_type=jnp.float32)                 # (TB, N1, N2)
        s = s - jnp.max(s, axis=-1, keepdims=True)
        e = jnp.exp(s)
        inv = pl.reciprocal(jnp.sum(e, axis=-1, keepdims=True), approx=True)
        p = e * inv                                                        # softmax over N2

        oh = jnp.einsum("bnm,bmd->bnd", p, vh3,
                        preferred_element_type=jnp.float32)                # (TB, N1, dh)

        # Fuse output projection: accumulate this head's contribution.
        acc = acc + jnp.dot(oh.reshape(tb * n1, dh), wp_ref[h],
                            preferred_element_type=jnp.float32)            # (TB*N1, out_dim)

    out = acc + b_ref[...]                                                 # + bias (broadcast)
    o_ref[...] = out.reshape(tb, n1, out_dim).astype(o_ref.dtype)


def mhca_pallas(q, kv, wq, wkv, wproj, bproj, *, head, tb=None):
    """MHCA forward (groups=1).  Weights stored as (in_dim, out_dim); bias (out_dim,)."""
    B, N1, q_dim = q.shape
    _, N2, kv_dim = kv.shape
    out_dim = wq.shape[1]
    dh = out_dim // head
    div = math.sqrt(dh)

    if tb is None:
        # Keep >= 2 grid steps when possible (v7x: 2 TensorCores), else whole batch.
        tb = B // 2 if (B >= 2 and B % 2 == 0) else 1
    assert B % tb == 0, "batch must be divisible by the batch tile"

    # Host-side weight preprocessing (folds into constants under jit):
    #   * split wkv -> wk, wv (PyTorch tensor_split(2, dim=-1): first half K).
    #   * reshape to head-leading layout; fold 1/sqrt(dh) into wq.
    wq_h = (wq * (1.0 / div)).reshape(q_dim, head, dh).transpose(1, 0, 2)   # (H, q_dim, dh)
    wk_h = wkv[:, :out_dim].reshape(kv_dim, head, dh).transpose(1, 0, 2)    # (H, kv_dim, dh)
    wv_h = wkv[:, out_dim:].reshape(kv_dim, head, dh).transpose(1, 0, 2)    # (H, kv_dim, dh)
    wp_h = wproj.reshape(head, dh, out_dim)                                 # (H, dh, out_dim)
    b2 = bproj.reshape(1, out_dim)

    kernel = functools.partial(_mhca_kernel, head=head, tb=tb, n1=N1, n2=N2,
                               dh=dh, out_dim=out_dim)

    return pl.pallas_call(
        kernel,
        out_shape=jax.ShapeDtypeStruct((B, N1, out_dim), q.dtype),
        grid_spec=pltpu.PrefetchScalarGridSpec(
            num_scalar_prefetch=0,
            grid=(B // tb,),
            in_specs=[
                pl.BlockSpec((tb, N1, q_dim), lambda b: (b, 0, 0)),
                pl.BlockSpec((tb, N2, kv_dim), lambda b: (b, 0, 0)),
                # Grid-invariant weights: constant index_map -> fetched once.
                pl.BlockSpec((head, q_dim, dh), lambda b: (0, 0, 0)),
                pl.BlockSpec((head, kv_dim, dh), lambda b: (0, 0, 0)),
                pl.BlockSpec((head, kv_dim, dh), lambda b: (0, 0, 0)),
                pl.BlockSpec((head, dh, out_dim), lambda b: (0, 0, 0)),
                pl.BlockSpec((1, out_dim), lambda b: (0, 0)),
            ],
            out_specs=pl.BlockSpec((tb, N1, out_dim), lambda b: (b, 0, 0)),
        ),
        compiler_params=pltpu.CompilerParams(
            dimension_semantics=("parallel",),
            vmem_limit_bytes=48 * 1024 * 1024),
    )(q, kv, wq_h, wk_h, wv_h, wp_h, b2)


def mhca_reference(q, kv, wq, wkv, wproj, bproj, *, head):
    """Pure-JAX reference mirroring the PyTorch forward (groups=1)."""
    B, N1, _ = q.shape
    N2 = kv.shape[1]
    out_dim = wq.shape[1]
    dh = out_dim // head
    div = math.sqrt(dh)

    qp = q @ wq                                   # (B, N1, out_dim)
    kvp = kv @ wkv                                # (B, N2, 2*out_dim)
    kp, vp = kvp[..., :out_dim], kvp[..., out_dim:]

    qh = qp.reshape(B, N1, head, dh).transpose(0, 2, 1, 3)   # (B, H, N1, dh)
    kh = kp.reshape(B, N2, head, dh).transpose(0, 2, 1, 3)   # (B, H, N2, dh)
    vh = vp.reshape(B, N2, head, dh).transpose(0, 2, 1, 3)   # (B, H, N2, dh)

    attn = jnp.einsum("bhnd,bhmd->bhnm", qh, kh) / div
    p = jax.nn.softmax(attn, axis=-1)
    out = jnp.einsum("bhnm,bhmd->bhnd", p, vh)
    out = out.transpose(0, 2, 1, 3).reshape(B, N1, out_dim)
    return out @ wproj + bproj


if __name__ == "__main__":
    # Small shapes consistent with the module (groups=1, qkv_bias=False, attn_drop=0).
    # out_dim=128 keeps the output / projection matmuls lane-dense.
    B, N1, N2 = 4, 16, 16
    q_dim, kv_dim, out_dim, head = 64, 64, 128, 4

    key = jax.random.PRNGKey(0)
    kq, kkv, kwq, kwkv, kwp, kbp = jax.random.split(key, 6)

    q = jax.random.normal(kq, (B, N1, q_dim), dtype=jnp.float32)
    kv = jax.random.normal(kkv, (B, N2, kv_dim), dtype=jnp.float32)

    # Deterministic synthetic parameters, stored as (in_dim, out_dim); qkv_bias=False.
    wq = jax.random.normal(kwq, (q_dim, out_dim), dtype=jnp.float32) * 0.05
    wkv = jax.random.normal(kwkv, (kv_dim, 2 * out_dim), dtype=jnp.float32) * 0.05
    wproj = jax.random.normal(kwp, (out_dim, out_dim), dtype=jnp.float32) * 0.05
    bproj = jax.random.normal(kbp, (out_dim,), dtype=jnp.float32) * 0.05

    out = mhca_pallas(q, kv, wq, wkv, wproj, bproj, head=head)
    out = jax.block_until_ready(out)

    ref = mhca_reference(q, kv, wq, wkv, wproj, bproj, head=head)
    assert out.shape == (B, N1, out_dim)
    # Tolerance accounts for the approximate-reciprocal softmax normalization.
    assert jnp.allclose(out, ref, atol=5e-3, rtol=5e-3), (
        f"max abs err {jnp.max(jnp.abs(out - ref))}")

    print("KERNEL_OK")
</pallas_src>

<mosaic_0001>
module attributes {stable_mosaic.version = 11 : i64} {
  func.func @_mhca_kernel(%arg0: i32, %arg1: memref<2x16x64xf32, #tpu.memory_space<vmem>>, %arg2: memref<2x16x64xf32, #tpu.memory_space<vmem>>, %arg3: memref<4x64x32xf32, #tpu.memory_space<vmem>>, %arg4: memref<4x64x32xf32, #tpu.memory_space<vmem>>, %arg5: memref<4x64x32xf32, #tpu.memory_space<vmem>>, %arg6: memref<4x32x128xf32, #tpu.memory_space<vmem>>, %arg7: memref<1x128xf32, #tpu.memory_space<vmem>>, %arg8: memref<2x16x128xf32, #tpu.memory_space<vmem>>) attributes {dimension_semantics = [#tpu.dimension_semantics<parallel>], iteration_bounds = array<i64: 2>, scalar_prefetch = 0 : i64, scratch_operands = 0 : i64, tpu.core_type = #tpu.core_type<tc>, window_params = [{transform_indices = @transform_0, window_bounds = array<i64: 2, 16, 64>}, {transform_indices = @transform_1, window_bounds = array<i64: 2, 16, 64>}, {pipeline_mode = #tpu.pipeline_mode<synchronous>, transform_indices = @transform_2, window_bounds = array<i64: 4, 64, 32>}, {pipeline_mode = #tpu.pipeline_mode<synchronous>, transform_indices = @transform_3, window_bounds = array<i64: 4, 64, 32>}, {pipeline_mode = #tpu.pipeline_mode<synchronous>, transform_indices = @transform_4, window_bounds = array<i64: 4, 64, 32>}, {pipeline_mode = #tpu.pipeline_mode<synchronous>, transform_indices = @transform_5, window_bounds = array<i64: 4, 32, 128>}, {pipeline_mode = #tpu.pipeline_mode<synchronous>, transform_indices = @transform_6, window_bounds = array<i64: 1, 128>}, {transform_indices = @transform_7, window_bounds = array<i64: 2, 16, 128>}]} {
    %c0 = arith.constant 0 : index
    %c0_0 = arith.constant 0 : index
    %c0_1 = arith.constant 0 : index
    %0 = vector.load %arg1[%c0, %c0_0, %c0_1] : memref<2x16x64xf32, #tpu.memory_space<vmem>>, vector<2x16x64xf32>
    %c0_2 = arith.constant 0 : index
    %c0_3 = arith.constant 0 : index
    %c0_4 = arith.constant 0 : index
    %1 = vector.load %arg2[%c0_2, %c0_3, %c0_4] : memref<2x16x64xf32, #tpu.memory_space<vmem>>, vector<2x16x64xf32>
    %2 = vector.shape_cast %0 : vector<2x16x64xf32> to vector<32x64xf32>
    %3 = vector.shape_cast %1 : vector<2x16x64xf32> to vector<32x64xf32>
    %cst = arith.constant 0.000000e+00 : f32
    %4 = vector.broadcast %cst : f32 to vector<32x128xf32>
    %c0_5 = arith.constant 0 : index
    %c0_6 = arith.constant 0 : index
    %c0_7 = arith.constant 0 : index
    %5 = vector.load %arg3[%c0_5, %c0_6, %c0_7] : memref<4x64x32xf32, #tpu.memory_space<vmem>>, vector<1x64x32xf32>
    %6 = vector.shape_cast %5 : vector<1x64x32xf32> to vector<64x32xf32>
    %cst_8 = arith.constant dense<0.000000e+00> : vector<32x32xf32>
    %7 = tpu.matmul %2, %6, %cst_8 {dimension_numbers = #tpu.dot_dimension_numbers<[1], [0], [0], [1], [0, 0, 1, 1], [], []>} : vector<32x64xf32>, vector<64x32xf32>, vector<32x32xf32> -> vector<32x32xf32>
    %c0_9 = arith.constant 0 : index
    %c0_10 = arith.constant 0 : index
    %c0_11 = arith.constant 0 : index
    %8 = vector.load %arg4[%c0_9, %c0_10, %c0_11] : memref<4x64x32xf32, #tpu.memory_space<vmem>>, vector<1x64x32xf32>
    %9 = vector.shape_cast %8 : vector<1x64x32xf32> to vector<64x32xf32>
    %cst_12 = arith.constant dense<0.000000e+00> : vector<32x32xf32>
    %10 = tpu.matmul %3, %9, %cst_12 {dimension_numbers = #tpu.dot_dimension_numbers<[1], [0], [0], [1], [0, 0, 1, 1], [], []>} : vector<32x64xf32>, vector<64x32xf32>, vector<32x32xf32> -> vector<32x32xf32>
    %c0_13 = arith.constant 0 : index
    %c0_14 = arith.constant 0 : index
    %c0_15 = arith.constant 0 : index
    %11 = vector.load %arg5[%c0_13, %c0_14, %c0_15] : memref<4x64x32xf32, #tpu.memory_space<vmem>>, vector<1x64x32xf32>
    %12 = vector.shape_cast %11 : vector<1x64x32xf32> to vector<64x32xf32>
    %cst_16 = arith.constant dense<0.000000e+00> : vector<32x32xf32>
    %13 = tpu.matmul %3, %12, %cst_16 {dimension_numbers = #tpu.dot_dimension_numbers<[1], [0], [0], [1], [0, 0, 1, 1], [], []>} : vector<32x64xf32>, vector<64x32xf32>, vector<32x32xf32> -> vector<32x32xf32>
    %14 = vector.shape_cast %7 : vector<32x32xf32> to vector<2x16x32xf32>
    %15 = vector.shape_cast %10 : vector<32x32xf32> to vector<2x16x32xf32>
    %16 = vector.shape_cast %13 : vector<32x32xf32> to vector<2x16x32xf32>
    "tpu.trace_start"() <{level = 10 : i32, message = "bnd,bmd->bnm"}> : () -> ()
    %cst_17 = arith.constant dense<0.000000e+00> : vector<2x16x16xf32>
    %17 = tpu.matmul %14, %15, %cst_17 {dimension_numbers = #tpu.dot_dimension_numbers<[2], [2], [1], [1], [0, 0, 0, 1, 1, 1], [0], [0]>} : vector<2x16x32xf32>, vector<2x16x32xf32>, vector<2x16x16xf32> -> vector<2x16x16xf32>
    "tpu.trace_stop"() : () -> ()
    %cst_18 = arith.constant dense<0xFF800000> : vector<2x16xf32>
    %18 = vector.multi_reduction <maximumf>, %17, %cst_18 [2] : vector<2x16x16xf32> to vector<2x16xf32>
    %19 = vector.shape_cast %18 : vector<2x16xf32> to vector<2x16x1xf32>
    %20 = vector.broadcast %19 : vector<2x16x1xf32> to vector<2x16x16xf32>
    %21 = arith.subf %17, %20 : vector<2x16x16xf32>
    %22 = math.exp %21 : vector<2x16x16xf32>
    %cst_19 = arith.constant dense<0.000000e+00> : vector<2x16xf32>
    %23 = vector.multi_reduction <add>, %22, %cst_19 [2] : vector<2x16x16xf32> to vector<2x16xf32>
    %24 = vector.shape_cast %23 : vector<2x16xf32> to vector<2x16x1xf32>
    %25 = tpu.reciprocal %24 {approx = true} : vector<2x16x1xf32> -> vector<2x16x1xf32>
    %26 = vector.broadcast %25 : vector<2x16x1xf32> to vector<2x16x16xf32>
    %27 = arith.mulf %22, %26 : vector<2x16x16xf32>
    "tpu.trace_start"() <{level = 10 : i32, message = "bnm,bmd->bnd"}> : () -> ()
    %cst_20 = arith.constant dense<0.000000e+00> : vector<2x16x32xf32>
    %28 = tpu.matmul %27, %16, %cst_20 {dimension_numbers = #tpu.dot_dimension_numbers<[2], [1], [1], [2], [0, 0, 0, 1, 1, 2], [0], [0]>} : vector<2x16x16xf32>, vector<2x16x32xf32>, vector<2x16x32xf32> -> vector<2x16x32xf32>
    "tpu.trace_stop"() : () -> ()
    %29 = vector.shape_cast %28 : vector<2x16x32xf32> to vector<32x32xf32>
    %c0_21 = arith.constant 0 : index
    %c0_22 = arith.constant 0 : index
    %c0_23 = arith.constant 0 : index
    %30 = vector.load %arg6[%c0_21, %c0_22, %c0_23] : memref<4x32x128xf32, #tpu.memory_space<vmem>>, vector<1x32x128xf32>
    %31 = vector.shape_cast %30 : vector<1x32x128xf32> to vector<32x128xf32>
    %cst_24 = arith.constant dense<0.000000e+00> : vector<32x128xf32>
    %32 = tpu.matmul %29, %31, %cst_24 {dimension_numbers = #tpu.dot_dimension_numbers<[1], [0], [0], [1], [0, 0, 1, 1], [], []>} : vector<32x32xf32>, vector<32x128xf32>, vector<32x128xf32> -> vector<32x128xf32>
    %33 = arith.addf %4, %32 : vector<32x128xf32>
    %c1 = arith.constant 1 : index
    %c0_25 = arith.constant 0 : index
    %c0_26 = arith.constant 0 : index
    %34 = vector.load %arg3[%c1, %c0_25, %c0_26] : memref<4x64x32xf32, #tpu.memory_space<vmem>>, vector<1x64x32xf32>
    %35 = vector.shape_cast %34 : vector<1x64x32xf32> to vector<64x32xf32>
    %cst_27 = arith.constant dense<0.000000e+00> : vector<32x32xf32>
    %36 = tpu.matmul %2, %35, %cst_27 {dimension_numbers = #tpu.dot_dimension_numbers<[1], [0], [0], [1], [0, 0, 1, 1], [], []>} : vector<32x64xf32>, vector<64x32xf32>, vector<32x32xf32> -> vector<32x32xf32>
    %c1_28 = arith.constant 1 : index
    %c0_29 = arith.constant 0 : index
    %c0_30 = arith.constant 0 : index
    %37 = vector.load %arg4[%c1_28, %c0_29, %c0_30] : memref<4x64x32xf32, #tpu.memory_space<vmem>>, vector<1x64x32xf32>
    %38 = vector.shape_cast %37 : vector<1x64x32xf32> to vector<64x32xf32>
    %cst_31 = arith.constant dense<0.000000e+00> : vector<32x32xf32>
    %39 = tpu.matmul %3, %38, %cst_31 {dimension_numbers = #tpu.dot_dimension_numbers<[1], [0], [0], [1], [0, 0, 1, 1], [], []>} : vector<32x64xf32>, vector<64x32xf32>, vector<32x32xf32> -> vector<32x32xf32>
    %c1_32 = arith.constant 1 : index
    %c0_33 = arith.constant 0 : index
    %c0_34 = arith.constant 0 : index
    %40 = vector.load %arg5[%c1_32, %c0_33, %c0_34] : memref<4x64x32xf32, #tpu.memory_space<vmem>>, vector<1x64x32xf32>
    %41 = vector.shape_cast %40 : vector<1x64x32xf32> to vector<64x32xf32>
    %cst_35 = arith.constant dense<0.000000e+00> : vector<32x32xf32>
    %42 = tpu.matmul %3, %41, %cst_35 {dimension_numbers = #tpu.dot_dimension_numbers<[1], [0], [0], [1], [0, 0, 1, 1], [], []>} : vector<32x64xf32>, vector<64x32xf32>, vector<32x32xf32> -> vector<32x32xf32>
    %43 = vector.shape_cast %36 : vector<32x32xf32> to vector<2x16x32xf32>
    %44 = vector.shape_cast %39 : vector<32x32xf32> to vector<2x16x32xf32>
    %45 = vector.shape_cast %42 : vector<32x32xf32> to vector<2x16x32xf32>
    "tpu.trace_start"() <{level = 10 : i32, message = "bnd,bmd->bnm"}> : () -> ()
    %cst_36 = arith.constant dense<0.000000e+00> : vector<2x16x16xf32>
    %46 = tpu.matmul %43, %44, %cst_36 {dimension_numbers = #tpu.dot_dimension_numbers<[2], [2], [1], [1], [0, 0, 0, 1, 1, 1], [0], [0]>} : vector<2x16x32xf32>, vector<2x16x32xf32>, vector<2x16x16xf32> -> vector<2x16x16xf32>
    "tpu.trace_stop"() : () -> ()
    %cst_37 = arith.constant dense<0xFF800000> : vector<2x16xf32>
    %47 = vector.multi_reduction <maximumf>, %46, %cst_37 [2] : vector<2x16x16xf32> to vector<2x16xf32>
    %48 = vector.shape_cast %47 : vector<2x16xf32> to vector<2x16x1xf32>
    %49 = vector.broadcast %48 : vector<2x16x1xf32> to vector<2x16x16xf32>
    %50 = arith.subf %46, %49 : vector<2x16x16xf32>
    %51 = math.exp %50 : vector<2x16x16xf32>
    %cst_38 = arith.constant dense<0.000000e+00> : vector<2x16xf32>
    %52 = vector.multi_reduction <add>, %51, %cst_38 [2] : vector<2x16x16xf32> to vector<2x16xf32>
    %53 = vector.shape_cast %52 : vector<2x16xf32> to vector<2x16x1xf32>
    %54 = tpu.reciprocal %53 {approx = true} : vector<2x16x1xf32> -> vector<2x16x1xf32>
    %55 = vector.broadcast %54 : vector<2x16x1xf32> to vector<2x16x16xf32>
    %56 = arith.mulf %51, %55 : vector<2x16x16xf32>
    "tpu.trace_start"() <{level = 10 : i32, message = "bnm,bmd->bnd"}> : () -> ()
    %cst_39 = arith.constant dense<0.000000e+00> : vector<2x16x32xf32>
    %57 = tpu.matmul %56, %45, %cst_39 {dimension_numbers = #tpu.dot_dimension_numbers<[2], [1], [1], [2], [0, 0, 0, 1, 1, 2], [0], [0]>} : vector<2x16x16xf32>, vector<2x16x32xf32>, vector<2x16x32xf32> -> vector<2x16x32xf32>
    "tpu.trace_stop"() : () -> ()
    %58 = vector.shape_cast %57 : vector<2x16x32xf32> to vector<32x32xf32>
    %c1_40 = arith.constant 1 : index
    %c0_41 = arith.constant 0 : index
    %c0_42 = arith.constant 0 : index
    %59 = vector.load %arg6[%c1_40, %c0_41, %c0_42] : memref<4x32x128xf32, #tpu.memory_space<vmem>>, vector<1x32x128xf32>
    %60 = vector.shape_cast %59 : vector<1x32x128xf32> to vector<32x128xf32>
    %cst_43 = arith.constant dense<0.000000e+00> : vector<32x128xf32>
    %61 = tpu.matmul %58, %60, %cst_43 {dimension_numbers = #tpu.dot_dimension_numbers<[1], [0], [0], [1], [0, 0, 1, 1], [], []>} : vector<32x32xf32>, vector<32x128xf32>, vector<32x128xf32> -> vector<32x128xf32>
    %62 = arith.addf %33, %61 : vector<32x128xf32>
    %c2 = arith.constant 2 : index
    %c0_44 = arith.constant 0 : index
    %c0_45 = arith.constant 0 : index
    %63 = vector.load %arg3[%c2, %c0_44, %c0_45] : memref<4x64x32xf32, #tpu.memory_space<vmem>>, vector<1x64x32xf32>
    %64 = vector.shape_cast %63 : vector<1x64x32xf32> to vector<64x32xf32>
    %cst_46 = arith.constant dense<0.000000e+00> : vector<32x32xf32>
    %65 = tpu.matmul %2, %64, %cst_46 {dimension_numbers = #tpu.dot_dimension_numbers<[1], [0], [0], [1], [0, 0, 1, 1], [], []>} : vector<32x64xf32>, vector<64x32xf32>, vector<32x32xf32> -> vector<32x32xf32>
    %c2_47 = arith.constant 2 : index
    %c0_48 = arith.constant 0 : index
    %c0_49 = arith.constant 0 : index
    %66 = vector.load %arg4[%c2_47, %c0_48, %c0_49] : memref<4x64x32xf32, #tpu.memory_space<vmem>>, vector<1x64x32xf32>
    %67 = vector.shape_cast %66 : vector<1x64x32xf32> to vector<64x32xf32>
    %cst_50 = arith.constant dense<0.000000e+00> : vector<32x32xf32>
    %68 = tpu.matmul %3, %67, %cst_50 {dimension_numbers = #tpu.dot_dimension_numbers<[1], [0], [0], [1], [0, 0, 1, 1], [], []>} : vector<32x64xf32>, vector<64x32xf32>, vector<32x32xf32> -> vector<32x32xf32>
    %c2_51 = arith.constant 2 : index
    %c0_52 = arith.constant 0 : index
    %c0_53 = arith.constant 0 : index
    %69 = vector.load %arg5[%c2_51, %c0_52, %c0_53] : memref<4x64x32xf32, #tpu.memory_space<vmem>>, vector<1x64x32xf32>
    %70 = vector.shape_cast %69 : vector<1x64x32xf32> to vector<64x32xf32>
    %cst_54 = arith.constant dense<0.000000e+00> : vector<32x32xf32>
    %71 = tpu.matmul %3, %70, %cst_54 {dimension_numbers = #tpu.dot_dimension_numbers<[1], [0], [0], [1], [0, 0, 1, 1], [], []>} : vector<32x64xf32>, vector<64x32xf32>, vector<32x32xf32> -> vector<32x32xf32>
    %72 = vector.shape_cast %65 : vector<32x32xf32> to vector<2x16x32xf32>
    %73 = vector.shape_cast %68 : vector<32x32xf32> to vector<2x16x32xf32>
    %74 = vector.shape_cast %71 : vector<32x32xf32> to vector<2x16x32xf32>
    "tpu.trace_start"() <{level = 10 : i32, message = "bnd,bmd->bnm"}> : () -> ()
    %cst_55 = arith.constant dense<0.000000e+00> : vector<2x16x16xf32>
    %75 = tpu.matmul %72, %73, %cst_55 {dimension_numbers = #tpu.dot_dimension_numbers<[2], [2], [1], [1], [0, 0, 0, 1, 1, 1], [0], [0]>} : vector<2x16x32xf32>, vector<2x16x32xf32>, vector<2x16x16xf32> -> vector<2x16x16xf32>
    "tpu.trace_stop"() : () -> ()
    %cst_56 = arith.constant dense<0xFF800000> : vector<2x16xf32>
    %76 = vector.multi_reduction <maximumf>, %75, %cst_56 [2] : vector<2x16x16xf32> to vector<2x16xf32>
    %77 = vector.shape_cast %76 : vector<2x16xf32> to vector<2x16x1xf32>
    %78 = vector.broadcast %77 : vector<2x16x1xf32> to vector<2x16x16xf32>
    %79 = arith.subf %75, %78 : vector<2x16x16xf32>
    %80 = math.exp %79 : vector<2x16x16xf32>
    %cst_57 = arith.constant dense<0.000000e+00> : vector<2x16xf32>
    %81 = vector.multi_reduction <add>, %80, %cst_57 [2] : vector<2x16x16xf32> to vector<2x16xf32>
    %82 = vector.shape_cast %81 : vector<2x16xf32> to vector<2x16x1xf32>
    %83 = tpu.reciprocal %82 {approx = true} : vector<2x16x1xf32> -> vector<2x16x1xf32>
    %84 = vector.broadcast %83 : vector<2x16x1xf32> to vector<2x16x16xf32>
    %85 = arith.mulf %80, %84 : vector<2x16x16xf32>
    "tpu.trace_start"() <{level = 10 : i32, message = "bnm,bmd->bnd"}> : () -> ()
    %cst_58 = arith.constant dense<0.000000e+00> : vector<2x16x32xf32>
    %86 = tpu.matmul %85, %74, %cst_58 {dimension_numbers = #tpu.dot_dimension_numbers<[2], [1], [1], [2], [0, 0, 0, 1, 1, 2], [0], [0]>} : vector<2x16x16xf32>, vector<2x16x32xf32>, vector<2x16x32xf32> -> vector<2x16x32xf32>
    "tpu.trace_stop"() : () -> ()
    %87 = vector.shape_cast %86 : vector<2x16x32xf32> to vector<32x32xf32>
    %c2_59 = arith.constant 2 : index
    %c0_60 = arith.constant 0 : index
    %c0_61 = arith.constant 0 : index
    %88 = vector.load %arg6[%c2_59, %c0_60, %c0_61] : memref<4x32x128xf32, #tpu.memory_space<vmem>>, vector<1x32x128xf32>
    %89 = vector.shape_cast %88 : vector<1x32x128xf32> to vector<32x128xf32>
    %cst_62 = arith.constant dense<0.000000e+00> : vector<32x128xf32>
    %90 = tpu.matmul %87, %89, %cst_62 {dimension_numbers = #tpu.dot_dimension_numbers<[1], [0], [0], [1], [0, 0, 1, 1], [], []>} : vector<32x32xf32>, vector<32x128xf32>, vector<32x128xf32> -> vector<32x128xf32>
    %91 = arith.addf %62, %90 : vector<32x128xf32>
    %c3 = arith.constant 3 : index
    %c0_63 = arith.constant 0 : index
    %c0_64 = arith.constant 0 : index
    %92 = vector.load %arg3[%c3, %c0_63, %c0_64] : memref<4x64x32xf32, #tpu.memory_space<vmem>>, vector<1x64x32xf32>
    %93 = vector.shape_cast %92 : vector<1x64x32xf32> to vector<64x32xf32>
    %cst_65 = arith.constant dense<0.000000e+00> : vector<32x32xf32>
    %94 = tpu.matmul %2, %93, %cst_65 {dimension_numbers = #tpu.dot_dimension_numbers<[1], [0], [0], [1], [0, 0, 1, 1], [], []>} : vector<32x64xf32>, vector<64x32xf32>, vector<32x32xf32> -> vector<32x32xf32>
    %c3_66 = arith.constant 3 : index
    %c0_67 = arith.constant 0 : index
    %c0_68 = arith.constant 0 : index
    %95 = vector.load %arg4[%c3_66, %c0_67, %c0_68] : memref<4x64x32xf32, #tpu.memory_space<vmem>>, vector<1x64x32xf32>
    %96 = vector.shape_cast %95 : vector<1x64x32xf32> to vector<64x32xf32>
    %cst_69 = arith.constant dense<0.000000e+00> : vector<32x32xf32>
    %97 = tpu.matmul %3, %96, %cst_69 {dimension_numbers = #tpu.dot_dimension_numbers<[1], [0], [0], [1], [0, 0, 1, 1], [], []>} : vector<32x64xf32>, vector<64x32xf32>, vector<32x32xf32> -> vector<32x32xf32>
    %c3_70 = arith.constant 3 : index
    %c0_71 = arith.constant 0 : index
    %c0_72 = arith.constant 0 : index
    %98 = vector.load %arg5[%c3_70, %c0_71, %c0_72] : memref<4x64x32xf32, #tpu.memory_space<vmem>>, vector<1x64x32xf32>
    %99 = vector.shape_cast %98 : vector<1x64x32xf32> to vector<64x32xf32>
    %cst_73 = arith.constant dense<0.000000e+00> : vector<32x32xf32>
    %100 = tpu.matmul %3, %99, %cst_73 {dimension_numbers = #tpu.dot_dimension_numbers<[1], [0], [0], [1], [0, 0, 1, 1], [], []>} : vector<32x64xf32>, vector<64x32xf32>, vector<32x32xf32> -> vector<32x32xf32>
    %101 = vector.shape_cast %94 : vector<32x32xf32> to vector<2x16x32xf32>
    %102 = vector.shape_cast %97 : vector<32x32xf32> to vector<2x16x32xf32>
    %103 = vector.shape_cast %100 : vector<32x32xf32> to vector<2x16x32xf32>
    "tpu.trace_start"() <{level = 10 : i32, message = "bnd,bmd->bnm"}> : () -> ()
    %cst_74 = arith.constant dense<0.000000e+00> : vector<2x16x16xf32>
    %104 = tpu.matmul %101, %102, %cst_74 {dimension_numbers = #tpu.dot_dimension_numbers<[2], [2], [1], [1], [0, 0, 0, 1, 1, 1], [0], [0]>} : vector<2x16x32xf32>, vector<2x16x32xf32>, vector<2x16x16xf32> -> vector<2x16x16xf32>
    "tpu.trace_stop"() : () -> ()
    %cst_75 = arith.constant dense<0xFF800000> : vector<2x16xf32>
    %105 = vector.multi_reduction <maximumf>, %104, %cst_75 [2] : vector<2x16x16xf32> to vector<2x16xf32>
    %106 = vector.shape_cast %105 : vector<2x16xf32> to vector<2x16x1xf32>
    %107 = vector.broadcast %106 : vector<2x16x1xf32> to vector<2x16x16xf32>
    %108 = arith.subf %104, %107 : vector<2x16x16xf32>
    %109 = math.exp %108 : vector<2x16x16xf32>
    %cst_76 = arith.constant dense<0.000000e+00> : vector<2x16xf32>
    %110 = vector.multi_reduction <add>, %109, %cst_76 [2] : vector<2x16x16xf32> to vector<2x16xf32>
    %111 = vector.shape_cast %110 : vector<2x16xf32> to vector<2x16x1xf32>
    %112 = tpu.reciprocal %111 {approx = true} : vector<2x16x1xf32> -> vector<2x16x1xf32>
    %113 = vector.broadcast %112 : vector<2x16x1xf32> to vector<2x16x16xf32>
    %114 = arith.mulf %109, %113 : vector<2x16x16xf32>
    "tpu.trace_start"() <{level = 10 : i32, message = "bnm,bmd->bnd"}> : () -> ()
    %cst_77 = arith.constant dense<0.000000e+00> : vector<2x16x32xf32>
    %115 = tpu.matmul %114, %103, %cst_77 {dimension_numbers = #tpu.dot_dimension_numbers<[2], [1], [1], [2], [0, 0, 0, 1, 1, 2], [0], [0]>} : vector<2x16x16xf32>, vector<2x16x32xf32>, vector<2x16x32xf32> -> vector<2x16x32xf32>
    "tpu.trace_stop"() : () -> ()
    %116 = vector.shape_cast %115 : vector<2x16x32xf32> to vector<32x32xf32>
    %c3_78 = arith.constant 3 : index
    %c0_79 = arith.constant 0 : index
    %c0_80 = arith.constant 0 : index
    %117 = vector.load %arg6[%c3_78, %c0_79, %c0_80] : memref<4x32x128xf32, #tpu.memory_space<vmem>>, vector<1x32x128xf32>
    %118 = vector.shape_cast %117 : vector<1x32x128xf32> to vector<32x128xf32>
    %cst_81 = arith.constant dense<0.000000e+00> : vector<32x128xf32>
    %119 = tpu.matmul %116, %118, %cst_81 {dimension_numbers = #tpu.dot_dimension_numbers<[1], [0], [0], [1], [0, 0, 1, 1], [], []>} : vector<32x32xf32>, vector<32x128xf32>, vector<32x128xf32> -> vector<32x128xf32>
    %120 = arith.addf %91, %119 : vector<32x128xf32>
    %c0_82 = arith.constant 0 : index
    %c0_83 = arith.constant 0 : index
    %121 = vector.load %arg7[%c0_82, %c0_83] : memref<1x128xf32, #tpu.memory_space<vmem>>, vector<1x128xf32>
    %122 = vector.broadcast %121 : vector<1x128xf32> to vector<32x128xf32>
    %123 = arith.addf %120, %122 : vector<32x128xf32>
    %124 = vector.shape_cast %123 : vector<32x128xf32> to vector<2x16x128xf32>
    %c0_84 = arith.constant 0 : index
    %c0_85 = arith.constant 0 : index
    %c0_86 = arith.constant 0 : index
    %125 = vector.load %arg8[%c0_84, %c0_85, %c0_86] : memref<2x16x128xf32, #tpu.memory_space<vmem>>, vector<2x16x128xf32>
    tpu.vector_store %arg8[%c0_84, %c0_85, %c0_86], %124 {strides = array<i32>} : memref<2x16x128xf32, #tpu.memory_space<vmem>>, vector<2x16x128xf32>,
    return
  }
  func.func @transform_0(%arg0: i32) -> (i32, i32, i32) {
    %c0_i32 = arith.constant 0 : i32
    %c0_i32_0 = arith.constant 0 : i32
    %c0_i32_1 = arith.constant 0 : i32
    return %arg0, %c0_i32, %c0_i32_0 : i32, i32, i32
  }
  func.func @transform_1(%arg0: i32) -> (i32, i32, i32) {
    %c0_i32 = arith.constant 0 : i32
    %c0_i32_0 = arith.constant 0 : i32
    %c0_i32_1 = arith.constant 0 : i32
    return %arg0, %c0_i32, %c0_i32_0 : i32, i32, i32
  }
  func.func @transform_2(%arg0: i32) -> (i32, i32, i32) {
    %c0_i32 = arith.constant 0 : i32
    %c0_i32_0 = arith.constant 0 : i32
    %c0_i32_1 = arith.constant 0 : i32
    %c0_i32_2 = arith.constant 0 : i32
    return %c0_i32, %c0_i32_0, %c0_i32_1 : i32, i32, i32
  }
  func.func @transform_3(%arg0: i32) -> (i32, i32, i32) {
    %c0_i32 = arith.constant 0 : i32
    %c0_i32_0 = arith.constant 0 : i32
    %c0_i32_1 = arith.constant 0 : i32
    %c0_i32_2 = arith.constant 0 : i32
    return %c0_i32, %c0_i32_0, %c0_i32_1 : i32, i32, i32
  }
  func.func @transform_4(%arg0: i32) -> (i32, i32, i32) {
    %c0_i32 = arith.constant 0 : i32
    %c0_i32_0 = arith.constant 0 : i32
    %c0_i32_1 = arith.constant 0 : i32
    %c0_i32_2 = arith.constant 0 : i32
    return %c0_i32, %c0_i32_0, %c0_i32_1 : i32, i32, i32
  }
  func.func @transform_5(%arg0: i32) -> (i32, i32, i32) {
    %c0_i32 = arith.constant 0 : i32
    %c0_i32_0 = arith.constant 0 : i32
    %c0_i32_1 = arith.constant 0 : i32
    %c0_i32_2 = arith.constant 0 : i32
    return %c0_i32, %c0_i32_0, %c0_i32_1 : i32, i32, i32
  }
  func.func @transform_6(%arg0: i32) -> (i32, i32) {
    %c0_i32 = arith.constant 0 : i32
    %c0_i32_0 = arith.constant 0 : i32
    %c0_i32_1 = arith.constant 0 : i32
    return %c0_i32, %c0_i32_0 : i32, i32
  }
  func.func @transform_7(%arg0: i32) -> (i32, i32, i32) {
    %c0_i32 = arith.constant 0 : i32
    %c0_i32_0 = arith.constant 0 : i32
    %c0_i32_1 = arith.constant 0 : i32
    return %arg0, %c0_i32, %c0_i32_0 : i32, i32, i32
  }
}

</mosaic_0001>

<bundles_post_ra>
// kernel: tpu_custom_call.1
= control target key start
LH: loop header
LB: loop body
LE: loop exit
PB: predicated region body
PF: predicated region fallthrough
CT: control target
= control target key end

     0   :  { %12 = vsyncpa [#allocation3], 0  ;;  %s5625_s0 = inlined_call_operand.vmem [shape: f32[4,16,64], index: 0, kind: input, shape index: {}]   ;;  %s5626_s1 = inlined_call_operand.vmem [shape: f32[4,16,64], index: 1, kind: input, shape index: {}]   ;;  %s5627_s2 = inlined_call_operand.vmem [shape: f32[4,64,32], index: 2, kind: input, shape index: {}]   ;;  %s5628_s3 = inlined_call_operand.vmem [shape: f32[4,64,32], index: 3, kind: input, shape index: {}]   ;;  %s5629_s4 = inlined_call_operand.vmem [shape: f32[4,64,32], index: 4, kind: input, shape index: {}]   ;;  %s5630_s5 = inlined_call_operand.vmem [shape: f32[4,32,128], index: 5, kind: input, shape index: {}]   ;;  %s5631_s6 = inlined_call_operand.vmem [shape: f32[1,128], index: 6, kind: input, shape index: {}]   ;;  %s5632_s7 = inlined_call_operand.hbm [shape: f32[4,16,128], index: 7, kind: output, shape index: {}]  }
   0x1   :  { %14 = vsyncpa [#allocation3 + $0x1], 0  ;;  %s4931_s24 = smov 0   ;;  %s4933_s25 = smov 0  }
   0x2   :  { %s4935_s26 = smov 0   ;;  %s4937_s27 = smov 0  }
   0x3 LB: > { %s4952_s28 = sadd.s32 4294967295, %s4886_s27   ;;  %s3507_s29 = sadd.s32 4294967294, %s4886_s27   ;;  %s4886_s27 = sphi %s4937_s27, %s5640_s27   ;;  %s4882_s26 = sphi %s4935_s26, %s5639_s26   ;;  %s4878_s25 = sphi %s4933_s25, %s5638_s25   ;;  %s4874_s24 = sphi %s4931_s24, %s5637_s24  }
   0x4   : > { %s4956_s30 = sadd.s32 1, %s4886_s27   ;;  %s184_s8 = sadd.s32 1, %s4882_s26 }
   0x5   : > { %s181_s9 = ssub.s32 %s4886_s27, %s4956_s30  ;;  %p194_p0 = scmp.ne.s32.totalorder %s4882_s26, %s4878_s25 }
   0x6   : > { %p182_p1 = scmp.eq.s32.totalorder %s181_s9, 0  ;;  %p195_p2 = scmp.eq.s32.totalorder %s4952_s28, 1 }
   0x7   : > { %p200_p3 = scmp.ne.s32.totalorder %s4878_s25, %s4874_s24  ;;  %p201_p4 = scmp.eq.s32.totalorder %s3507_s29, 1 }
   0x8   : > { %s4967_s10 = scalar_select %p182_p1, %s4882_s26, %s184_s8  }
   0x9   : > { %p4969_p5 = por %p195_p2, %p194_p0  ;;  %p4973_p6 = por %p201_p4, %p200_p3 }
   0xa   : > { %p3510_p7 = scmp.ge.s32.totalorder %s4886_s27, 1  ;;  %p254_p8 = scmp.lt.s32.totalorder %s4886_s27, 3 }
   0xc   : > { %p255_p9 = pnand %p3510_p7, %p254_p8 }
   0xd   : > { %v422_v0 = vld [vmem:[%s5628_s3] sm:$0xff] (!%p255_p9)  ;;  %v423_v1 = vld [vmem:[%s5628_s3 + $0x8] sm:$0xff] (!%p255_p9)  ;;  %v424_v2 = vld [vmem:[%s5628_s3 + $0x10] sm:$0xff] (!%p255_p9)  ;;  %s3512_s19 = sshll.u32 (!%p255_p9), %s4952_s28, 1  ;;  %vm324_vm0 = vcmask (!%p255_p9), 523264   ;;  %vm620_vm1 = vcmask (!%p255_p9), 261120  }
   0xe   : > { %258 = sbr.rel (%p255_p9) target bundleno = 3978 (0xf8a), region = 48  ;;  %v4413_v3 = vpack.c.bf16 (!%p255_p9), %v423_v1, %v422_v0  ;;  %v425_v4 = vld [vmem:[%s5628_s3 + $0x18] sm:$0xff] (!%p255_p9)  ;;  %v426_v5 = vld [vmem:[%s5628_s3 + $0x20] sm:$0xff] (!%p255_p9)  ;;  %p294_p10 = scmp.lt.s32.totalorder (!%p255_p9), %s3512_s19, 3  ;;  %v427_v7 = vld [vmem:[%s5628_s3 + $0x28] sm:$0xff] (!%p255_p9)  ;;  %vm795_vm3 = vcmask (!%p255_p9), 130048  }
   0xf   : > { %v4417_v6 = vpack.c.bf16 (!%p255_p9), %v425_v4, %v424_v2  ;;  %v316_v8 = vld [vmem:[%s5627_s2] sm:$0xff] (!%p255_p9)  ;;  %v317_v9 = vld [vmem:[%s5627_s2 + $0x8] sm:$0xff] (!%p255_p9)  ;;  %v318_v11 = vld [vmem:[%s5627_s2 + $0x10] sm:$0xff] (!%p255_p9)  ;;  %v4421_v16 = vpack.c.bf16 (!%p255_p9), %v427_v7, %v426_v5  ;;  %s290_s21 = sand.u32 (!%p255_p9), 1, %s4878_s25  }
  0x10   : > { %4414 = vmatprep.subr.bf16.mxu1 (!%p255_p9), %v4413_v3  ;;  %v4397_v10 = vpack.c.bf16 (!%p255_p9), %v317_v9, %v316_v8  ;;  %v319_v12 = vld [vmem:[%s5627_s2 + $0x18] sm:$0xff] (!%p255_p9)  ;;  %v320_v14 = vld [vmem:[%s5627_s2 + $0x20] sm:$0xff] (!%p255_p9)  ;;  %v321_v15 = vld [vmem:[%s5627_s2 + $0x28] sm:$0xff] (!%p255_p9)  ;;  %s3511_s22 = sshll.u32 (!%p255_p9), %s290_s21, 5 }
  0x11   : > { %4416 = vmatpush3.bf16.msra.mxu1 (!%p255_p9), %v4413_v3  ;;  %v4401_v13 = vpack.c.bf16 (!%p255_p9), %v319_v12, %v318_v11  ;;  %v428_v17 = vld [vmem:[%s5628_s3 + $0x30] sm:$0xff] (!%p255_p9)  ;;  %v429_v18 = vld [vmem:[%s5628_s3 + $0x38] sm:$0xff] (!%p255_p9)  ;;  %v4405_v20 = vpack.c.bf16 (!%p255_p9), %v321_v15, %v320_v14  ;;  %vm5082_vm2 = vmpackc.low (!%p255_p9), %vm620_vm1, %vm620_vm1 }
  0x12   : > { %4418 = vmatprep.subr.bf16.mxu1 (!%p255_p9), %v4417_v6  ;;  %4398 = vmatprep.subr.bf16.mxu0 (!%p255_p9), %v4397_v10  ;;  %v322_v21 = vld [vmem:[%s5627_s2 + $0x30] sm:$0xff] (!%p255_p9)  ;;  %v323_v22 = vld [vmem:[%s5627_s2 + $0x38] sm:$0xff] (!%p255_p9)  ;;  %v4425_v24 = vpack.c.bf16 (!%p255_p9), %v429_v18, %v428_v17  ;;  %v527_v43 = vld [vmem:[%s5629_s4] sm:$0xff] (!%p255_p9) }
  0x13   : > { %4400 = vmatpush3.bf16.msra.mxu0 (!%p255_p9), %v4397_v10  ;;  %v4409_v25 = vpack.c.bf16 (!%p255_p9), %v323_v22, %v322_v21  ;;  %v528_v44 = vld [vmem:[%s5629_s4 + $0x8] sm:$0xff] (!%p255_p9)  ;;  %v529_v45 = vld [vmem:[%s5629_s4 + $0x10] sm:$0xff] (!%p255_p9)  ;;  %v530_v47 = vld [vmem:[%s5629_s4 + $0x18] sm:$0xff] (!%p255_p9) }
  0x14   : > { %4402 = vmatprep.subr.bf16.mxu0 (!%p255_p9), %v4401_v13  ;;  %v4429_v46 = vpack.c.bf16 (!%p255_p9), %v528_v44, %v527_v43  ;;  %v4433_v48 = vpack.c.bf16 (!%p255_p9), %v530_v47, %v529_v45  ;;  %v531_v49 = vld [vmem:[%s5629_s4 + $0x20] sm:$0xff] (!%p255_p9)  ;;  %v532_v50 = vld [vmem:[%s5629_s4 + $0x28] sm:$0xff] (!%p255_p9)  ;;  %v533_v52 = vld [vmem:[%s5629_s4 + $0x30] sm:$0xff] (!%p255_p9) }
  0x15   : > { %s5642_s19 = smov (!%p294_p10, %s3512_s19), 3  ;;  %4420 = vmatpush3.bf16.msra.mxu1 %v4417_v6  ;;  %v4437_v51 = vpack.c.bf16 %v532_v50, %v531_v49  ;;  %v534_v53 = vld [vmem:[%s5629_s4 + $0x38] sm:$0xff]  ;;  %v3554_v21 = vld [vmem:[%s5628_s3 + $0x40] sm:$0xff]  ;;  %v3555_v22 = vld [vmem:[%s5628_s3 + $0x48] sm:$0xff] }
  0x16   : > { %s3721_s8 = sshll.u32 %s5642_s19, 4  ;;  %4422 = vmatprep.subr.bf16.mxu1 %v4421_v16  ;;  %v4441_v54 = vpack.c.bf16 %v534_v53, %v533_v52  ;;  %v3560_v43 = vld [vmem:[%s5628_s3 + $0x70] sm:$0xff]  ;;  %v3561_v44 = vld [vmem:[%s5628_s3 + $0x78] sm:$0xff]  ;;  %v3542_v52 = vld [vmem:[%s5627_s2 + $0x40] sm:$0xff] }
  0x17   : > { %s5025_s18 = scalar_lea.vmem %s5626_s1, %s3721_s8  ;;  %s5030_s19 = scalar_lea.vmem %s5625_s0, %s3721_s8  ;;  %4404 = vmatpush3.bf16.msra.mxu0 %v4401_v13  ;;  %v4493_v45 = vpack.c.bf16 %v3561_v44, %v3560_v43  ;;  %v3543_v53 = vld [vmem:[%s5627_s2 + $0x48] sm:$0xff]  ;;  %v3685_v34 = vld [vmem:[%s5629_s4 + $0xd8] sm:$0xff] }
  0x18   : > { %v5033_v19 = vld [vmem:[%s5025_s18] sm:$0xff]  ;;  %4406 = vmatprep.subr.bf16.mxu0 %v4405_v20  ;;  %v5049_v26 = vld [vmem:[%s5025_s18 + $0x8] sm:$0xff]  ;;  %v5052_v27 = vld [vmem:[%s5025_s18 + $0x10] sm:$0xff]  ;;  %s3724_s8 = sshll.u32 %s4952_s28, 9  ;;  %s4888_s28 = smov [#allocation2]  }
  0x19   : > { %4003 = vmatprep.mubr.msk.f32.mxu1 %vm324_vm0, %v5033_v19  ;;  %v5044_v23 = vld [vmem:[%s5030_s19] sm:$0xff]  ;;  %4424 = vmatpush3.bf16.msra.mxu1 %v4421_v16  ;;  %v5055_v28 = vld [vmem:[%s5030_s19 + $0x8] sm:$0xff]  ;;  %v5060_v29 = vld [vmem:[%s5030_s19 + $0x10] sm:$0xff]  ;;  %s5582_s15 = scalar_lea.hbm %s5632_s7, %s3724_s8  ;;  %s4828_s17 = sshll.u32 %s4888_s28, 4  ;;  %s4829_s17 = int_to_ptr.vmem [resolvable:$false] %s4828_s17 }
  0x1a   : > { %3981 = vmatprep.mubr.msk.f32.mxu0 %vm324_vm0, %v5044_v23  ;;  %4426 = vmatprep.subr.bf16.mxu1 %v4425_v24  ;;  %v5065_v30 = vld [vmem:[%s5025_s18 + $0x18] sm:$0xff]  ;;  %s4830_s20 = scalar_lea.vmem %s4829_s17, 1024 }
  0x1b   : > { %4408 = vmatpush3.bf16.msra.mxu0 %v4405_v20  ;;  %v5072_v31 = vld [vmem:[%s5030_s19 + $0x18] sm:$0xff] }
  0x1c   : > { %4410 = vmatprep.subr.bf16.mxu0 %v4409_v25 }
  0x1d   : > { %4428 = vmatpush3.bf16.msra.mxu1 %v4425_v24 }
  0x1f   : > { %4412 = vmatpush3.bf16.msra.mxu0 %v4409_v25  ;;  %v4481_v25 = vpack.c.bf16 %v3555_v22, %v3554_v21  ;;  %v3566_v21 = vld [vmem:[%s5629_s4 + $0x40] sm:$0xff]  ;;  %v3567_v22 = vld [vmem:[%s5629_s4 + $0x48] sm:$0xff] }
  0x20   : > { %4004 = vmatmul.mubr.msk.f32.vlgmr.msra.gmra.mrb[0].mxu1 %vm324_vm0, %v5049_v26  ;;  %4430 = vmatprep.subr.bf16.mxu0 %v4429_v46 }
  0x21   : > { %4006 = vmatprep.mubr.msk.f32.mxu1 %vm324_vm0, %v5052_v27 }
  0x22   : > { %3982 = vmatmul.mubr.msk.f32.vlgmr.msra.gmra.mrb[0].mxu0 %vm324_vm0, %v5055_v28 }
  0x23   : > { %3984 = vmatprep.mubr.msk.f32.mxu0 %vm324_vm0, %v5060_v29  ;;  %4432 = vmatpush3.bf16.msra.mxu0 %v4429_v46 }
  0x24   : > { %4007 = vmatmul.mubr.msk.f32.gmra.mrb[2].mxu1 %vm324_vm0, %v5065_v30  ;;  %4434 = vmatprep.subr.bf16.mxu0 %v4433_v48 }
  0x26   : > { %3985 = vmatmul.mubr.msk.f32.gmra.mrb[2].mxu0 %vm324_vm0, %v5072_v31 }
  0x27   : > { %4025 = vmatprep.mubr.msk.f32.mxu0 %vm324_vm0, %v5033_v19  ;;  %4436 = vmatpush3.bf16.msra.mxu0 %v4433_v48 }
  0x28   : > { %4438 = vmatprep.subr.bf16.mxu0 %v4437_v51 }
  0x2b   : > { %4440 = vmatpush3.bf16.msra.mxu0 %v4437_v51 }
  0x2c   : > { %4442 = vmatprep.subr.bf16.mxu0 %v4441_v54 }
  0x2f   : > { %4444 = vmatpush3.bf16.msra.mxu0 %v4441_v54 }
  0x30   : > { %4482 = vmatprep.subr.bf16.mxu0 %v4481_v25 }
  0x32   : > { %4026 = vmatmul.mubr.msk.f32.vlgmr.msra.gmra.mrb[4].mxu0 %vm324_vm0, %v5049_v26 }
  0x33   : > { %4028 = vmatprep.mubr.msk.f32.mxu0 %vm324_vm0, %v5052_v27  ;;  %4484 = vmatpush3.bf16.msra.mxu0 %v4481_v25  ;;  %v4497_v25 = vpack.c.bf16 %v3567_v22, %v3566_v21 }
  0x36   : > { %4029 = vmatmul.mubr.msk.f32.gmra.mrb[6].mxu0 %vm324_vm0, %v5065_v30 }
  0x37   : > { %4097 = vmatprep.mubr.msk.f32.mxu0 %vm324_vm0, %v5033_v19 }
  0xf3   : > { %v4005_v32 = vpop.f32.mrb[0].mxu1 }
  0xf4   : > { %v508_v33 = vpop.f32.mrb[1].mxu1 }
  0xf5   : > { %v4445_v35 = vpack.c.bf16 %v4005_v32, %v508_v33  ;;  %v3983_v36 = vpop.f32.mrb[0].mxu0  ;;  %v3556_v33 = vld [vmem:[%s5628_s3 + $0x50] sm:$0xff] }
  0xf6   : > { %v403_v37 = vpop.f32.mrb[1].mxu0 }
  0xf7   : > { %4447 = vmatprep.subr.msk.bf16.mxu1 %vm5082_vm2, %v4445_v35  ;;  %v4008_v38 = vpop.f32.mrb[2].mxu1  ;;  %4035 = vmatprep.mubr.msk.f32.mxu1 %vm620_vm1, %v403_v37 }
  0xf8   : > { %4450 = vmatpush3.bf16.xpose.msk.msra.mxu1 %vm5082_vm2, %v4445_v35  ;;  %v518_v39 = vpop.f32.mrb[3].mxu1  ;;  %v3557_v35 = vld [vmem:[%s5628_s3 + $0x58] sm:$0xff] }
  0xf9   : > { %v4451_v40 = vpack.c.bf16 %v4008_v38, %v518_v39  ;;  %v3986_v41 = vpop.f32.mrb[2].mxu0  ;;  %v4485_v37 = vpack.c.bf16 %v3557_v35, %v3556_v33  ;;  %v3570_v35 = vld [vmem:[%s5629_s4 + $0x60] sm:$0xff] }
  0xfa   : > { %v413_v42 = vpop.f32.mrb[3].mxu0 }
  0xfb   : > { %4453 = vmatprep.subr.msk.bf16.mxu1 %vm5082_vm2, %v4451_v40  ;;  %4486 = vmatprep.subr.bf16.mxu0 %v4485_v37 }
  0xfc   : > { %4488 = vmatpush3.bf16.msra.mxu0 %v4485_v37 }
  0xff   : > { %4036 = vmatmul.mubr.msk.f32.vlgmr.msra.gmra.mrb[4].mxu1 %vm620_vm1, %v3983_v36 }
 0x100   : > { %4456 = vmatpush3.bf16.xpose.msk.msra.mxu1 %vm5082_vm2, %v4451_v40  ;;  %4042 = vmatprep.mubr.msk.f32.mxu1 %vm620_vm1, %v413_v42  ;;  %v3558_v40 = vld [vmem:[%s5628_s3 + $0x60] sm:$0xff] }
 0x105   : > { %v4027_v20 = vpop.f32.mrb[4].mxu0 }
 0x106   : > { %v601_v24 = vpop.f32.mrb[5].mxu0 }
 0x107   : > { %4043 = vmatmul.mubr.msk.f32.vlgmr.msra.gmra.mrb[6].mxu1 %vm620_vm1, %v3986_v41  ;;  %v4457_v32 = vpack.c.bf16 %v4027_v20, %v601_v24  ;;  %v3559_v41 = vld [vmem:[%s5628_s3 + $0x68] sm:$0xff]  ;;  %v3568_v24 = vld [vmem:[%s5629_s4 + $0x50] sm:$0xff] }
 0x108   : > { %v4489_v42 = vpack.c.bf16 %v3559_v41, %v3558_v40 }
 0x109   : > { %4458 = vmatprep.subr.bf16.mxu1 %v4457_v32  ;;  %v4030_v36 = vpop.f32.mrb[6].mxu0 }
 0x10a   : > { %4460 = vmatpush3.bf16.msra.mxu1 %v4457_v32  ;;  %v611_v38 = vpop.f32.mrb[7].mxu0  ;;  %4490 = vmatprep.subr.bf16.mxu0 %v4489_v42  ;;  %v3569_v32 = vld [vmem:[%s5629_s4 + $0x58] sm:$0xff] }
 0x10b   : > { %v4461_v39 = vpack.c.bf16 %v4030_v36, %v611_v38  ;;  %4492 = vmatpush3.bf16.msra.mxu0 %v4489_v42  ;;  %v4501_v33 = vpack.c.bf16 %v3569_v32, %v3568_v24  ;;  %v3571_v36 = vld [vmem:[%s5629_s4 + $0x68] sm:$0xff]  ;;  %v3572_v38 = vld [vmem:[%s5629_s4 + $0x70] sm:$0xff]  ;;  %v3593_v32 = vld [vmem:[%s5630_s5 + $0x38] sm:$0xff] }
 0x10c   : > { %4494 = vmatprep.subr.bf16.mxu0 %v4493_v45  ;;  %v4505_v37 = vpack.c.bf16 %v3571_v36, %v3570_v35 }
 0x10d   : > { %4462 = vmatprep.subr.bf16.mxu1 %v4461_v39 }
 0x10f   : > { %4496 = vmatpush3.bf16.msra.mxu0 %v4493_v45 }
 0x112   : > { %4098 = vmatmul.mubr.msk.f32.vlgmr.msra.gmra.mrb[8].mxu0 %vm324_vm0, %v5049_v26 }
 0x113   : > { %4100 = vmatprep.mubr.msk.f32.mxu0 %vm324_vm0, %v5052_v27 }
 0x116   : > { %4101 = vmatmul.mubr.msk.f32.gmra.mrb[10].mxu0 %vm324_vm0, %v5065_v30 }
 0x1d2   : > { %v4037_v55 = vpop.f32.mrb[4].mxu1 }
 0x1d3   : > { %v699_v56 = vpop.f32.mrb[5].mxu1  ;;  %v799_v58 = vsel %vm795_vm3, %v4037_v55, -inf }
 0x1d4   : > { %v796_v57 = vsel %vm795_vm3, %v699_v56, -inf }
 0x1d5   : > { %797 = vmax.xlane.f32.xlu0 %v796_v57 }
 0x1d9   : > { %800 = vmax.xlane.f32.xlu0 %v799_v58 }
 0x1da   : > { %v4044_v59 = vpop.f32.mrb[6].mxu1 }
 0x1db   : > { %v786_v60 = vpop.f32.mrb[7].mxu1  ;;  %v805_v62 = vsel %vm795_vm3, %v4044_v59, -inf }
 0x1dc   : > { %v802_v61 = vsel %vm795_vm3, %v786_v60, -inf }
 0x1dd   : > { %803 = vmax.xlane.f32.xlu1 %v802_v61 }
 0x1e1   : > { %806 = vmax.xlane.f32.xlu1 %v805_v62 }
 0x262   : > { %v798_v63 = vpop.xlane.xlu0 %797 }
 0x263   : > { %v808_v0 = vsub.f32 %v699_v56, %v798_v63  ;;  %v4465_v56 = vpack.c.bf16 %v3543_v53, %v3542_v52 }
 0x265   : > { %v812_v1 = vmul.f32 1.442695, %v808_v0  ;;  %v3546_v0 = vld [vmem:[%s5627_s2 + $0x60] sm:$0xff] }
 0x266   : > { %v801_v2 = vpop.xlane.xlu0 %800 }
 0x267   : > { %4754 = vpow2.f32 %v812_v1  ;;  %v809_v3 = vsub.f32 %v4037_v55, %v801_v2  ;;  %v3547_v1 = vld [vmem:[%s5627_s2 + $0x68] sm:$0xff] }
 0x268   : > { %v4473_v2 = vpack.c.bf16 %v3547_v1, %v3546_v0 }
 0x269   : > { %v814_v4 = vmul.f32 1.442695, %v809_v3  ;;  %v3548_v3 = vld [vmem:[%s5627_s2 + $0x70] sm:$0xff] }
 0x26a   : > { %v804_v5 = vpop.xlane.xlu1 %803 }
 0x26b   : > { %4756 = vpow2.f32 %v814_v4  ;;  %v810_v6 = vsub.f32 %v786_v60, %v804_v5  ;;  %v3545_v60 = vld [vmem:[%s5627_s2 + $0x58] sm:$0xff] }
 0x26c   : > { %v3549_v4 = vld [vmem:[%s5627_s2 + $0x78] sm:$0xff] }
 0x26d   : > { %v816_v7 = vmul.f32 1.442695, %v810_v6  ;;  %v4477_v5 = vpack.c.bf16 %v3549_v4, %v3548_v3  ;;  %v4099_v6 = vpop.f32.mrb[8].mxu0 }
 0x26e   : > { %v807_v8 = vpop.xlane.xlu1 %806 }
 0x26f   : > { %4758 = vpow2.f32 %v816_v7  ;;  %v811_v9 = vsub.f32 %v4044_v59, %v807_v8  ;;  %v3544_v59 = vld [vmem:[%s5627_s2 + $0x50] sm:$0xff]  ;;  %v1175_v7 = vpop.f32.mrb[9].mxu0 }
 0x270   : > { %v4469_v63 = vpack.c.bf16 %v3545_v60, %v3544_v59  ;;  %v4513_v8 = vpack.c.bf16 %v4099_v6, %v1175_v7 }
 0x271   : > { %v4755_v10 = vpop.eup %4754  ;;  %v818_v11 = vmul.f32 1.442695, %v811_v9  ;;  %v4102_v9 = vpop.f32.mrb[10].mxu0 }
 0x272   : > { %v820_v12 = vsel %vm795_vm3, %v4755_v10, 0.0  ;;  %4515 = vmatprep.subr.msk.bf16.mxu0 %vm5082_vm2, %v4513_v8 }
 0x273   : > { %4760 = vpow2.f32 %v818_v11  ;;  %821 = vadd.xlane.f32.xlu0 %v820_v12  ;;  %4518 = vmatpush3.bf16.xpose.msk.msra.mxu0 %vm5082_vm2, %v4513_v8 }
 0x275   : > { %v4757_v13 = vpop.eup %4756 }
 0x276   : > { %v823_v14 = vsel %vm795_vm3, %v4757_v13, 0.0 }
 0x277   : > { %824 = vadd.xlane.f32.xlu1 %v823_v14 }
 0x279   : > { %v4759_v15 = vpop.eup %4758 }
 0x27a   : > { %v826_v16 = vsel %vm795_vm3, %v4759_v15, 0.0 }
 0x27b   : > { %827 = vadd.xlane.f32.xlu0 %v826_v16 }
 0x27d   : > { %v4761_v17 = vpop.eup %4760 }
 0x27e   : > { %v829_v18 = vsel %vm795_vm3, %v4761_v17, 0.0 }
 0x27f   : > { %830 = vadd.xlane.f32.xlu1 %v829_v18 }
 0x300   : > { %v822_v46 = vpop.xlane.xlu0 %821 }
 0x301   : > { %4762 = vrcp.f32 %v822_v46 }
 0x304   : > { %v825_v47 = vpop.xlane.xlu1 %824 }
 0x305   : > { %4764 = vrcp.f32 %v825_v47 }
 0x308   : > { %v828_v48 = vpop.xlane.xlu0 %827 }
 0x309   : > { %4766 = vrcp.f32 %v828_v48 }
 0x30b   : > { %v4763_v49 = vpop.eup %4762 }
 0x30c   : > { %v831_v50 = vpop.xlane.xlu1 %830  ;;  %v836_v51 = vmul.f32 %v4763_v49, %v4755_v10  ;;  %v1185_v10 = vpop.f32.mrb[11].mxu0 }
 0x30d   : > { %4768 = vrcp.f32 %v831_v50  ;;  %v4519_v11 = vpack.c.bf16 %v4102_v9, %v1185_v10 }
 0x30e   : > { %4049 = vmatprep.mubr.msk.f32.mxu1 %vm795_vm3, %v836_v51 }
 0x30f   : > { %v4765_v54 = vpop.eup %4764  ;;  %4521 = vmatprep.subr.msk.bf16.mxu0 %vm5082_vm2, %v4519_v11 }
 0x310   : > { %v837_v55 = vmul.f32 %v4765_v54, %v4757_v13 }
 0x312   : > { %4050 = vmatmul.mubr.msk.f32.vlgmr.msra.gmra.mrb[8].mxu1 %vm795_vm3, %v837_v55 }
 0x313   : > { %v4767_v57 = vpop.eup %4766  ;;  %4464 = vmatpush3.bf16.msra.mxu1 %v4461_v39  ;;  %v3573_v39 = vld [vmem:[%s5629_s4 + $0x78] sm:$0xff] }
 0x314   : > { %v838_v58 = vmul.f32 %v4767_v57, %v4759_v15  ;;  %4466 = vmatprep.subr.bf16.mxu1 %v4465_v56  ;;  %v4509_v40 = vpack.c.bf16 %v3573_v39, %v3572_v38 }
 0x316   : > { %4056 = vmatprep.mubr.msk.f32.mxu1 %vm795_vm3, %v838_v58 }
 0x317   : > { %v4769_v61 = vpop.eup %4768 }
 0x318   : > { %v839_v62 = vmul.f32 %v4769_v61, %v4761_v17 }
 0x31a   : > { %4057 = vmatmul.mubr.msk.f32.vlgmr.msra.gmra.mrb[10].mxu1 %vm795_vm3, %v839_v62 }
 0x31b   : > { %4468 = vmatpush3.bf16.msra.mxu1 %v4465_v56  ;;  %4075 = vmatprep.mubr.msk.f32.mxu1 %vm324_vm0, %v5044_v23 }
 0x31c   : > { %4470 = vmatprep.subr.bf16.mxu1 %v4469_v63 }
 0x31f   : > { %4472 = vmatpush3.bf16.msra.mxu1 %v4469_v63 }
 0x320   : > { %4474 = vmatprep.subr.bf16.mxu1 %v4473_v2 }
 0x323   : > { %4476 = vmatpush3.bf16.msra.mxu1 %v4473_v2 }
 0x324   : > { %4478 = vmatprep.subr.bf16.mxu1 %v4477_v5 }
 0x327   : > { %4480 = vmatpush3.bf16.msra.mxu1 %v4477_v5 }
 0x328   : > { %4498 = vmatprep.subr.bf16.mxu1 %v4497_v25 }
 0x32a   : > { %4076 = vmatmul.mubr.msk.f32.vlgmr.msra.gmra.mrb[12].mxu1 %vm324_vm0, %v5055_v28 }
 0x32b   : > { %4078 = vmatprep.mubr.msk.f32.mxu1 %vm324_vm0, %v5060_v29  ;;  %4500 = vmatpush3.bf16.msra.mxu1 %v4497_v25  ;;  %v3592_v25 = vld [vmem:[%s5630_s5 + $0x30] sm:$0xff] }
 0x32c   : > { %4502 = vmatprep.subr.bf16.mxu1 %v4501_v33 }
 0x32e   : > { %4079 = vmatmul.mubr.msk.f32.gmra.mrb[14].mxu1 %vm324_vm0, %v5072_v31 }
 0x32f   : > { %4119 = vmatprep.mubr.msk.f32.mxu1 %vm324_vm0, %v5033_v19  ;;  %4504 = vmatpush3.bf16.msra.mxu1 %v4501_v33 }
 0x330   : > { %4506 = vmatprep.subr.bf16.mxu1 %v4505_v37 }
 0x333   : > { %4508 = vmatpush3.bf16.msra.mxu1 %v4505_v37  ;;  %v4537_v37 = vpack.c.bf16 %v3593_v32, %v3592_v25  ;;  %v3621_v25 = vld [vmem:[%s5628_s3 + $0xb8] sm:$0xff] }
 0x334   : > { %4510 = vmatprep.subr.bf16.mxu1 %v4509_v40 }
 0x337   : > { %4512 = vmatpush3.bf16.msra.mxu1 %v4509_v40 }
 0x33a   : > { %4120 = vmatmul.mubr.msk.f32.vlgmr.msra.gmra.mrb[16].mxu1 %vm324_vm0, %v5049_v26 }
 0x33b   : > { %4122 = vmatprep.mubr.msk.f32.mxu1 %vm324_vm0, %v5052_v27 }
 0x33e   : > { %4123 = vmatmul.mubr.msk.f32.gmra.mrb[18].mxu1 %vm324_vm0, %v5065_v30 }
 0x3e5   : > { %v5212_v12 = vpop.f32.mrb[8].mxu1 }
 0x3e6   : > { %v5214_v13 = vpop.f32.mrb[9].mxu1 }
 0x3ed   : > { %v5216_v14 = vpop.f32.mrb[10].mxu1 }
 0x3ee   : > { %v5218_v15 = vpop.f32.mrb[11].mxu1 }
 0x3fd   : > { %v4077_v16 = vpop.f32.mrb[12].mxu1 }
 0x3fe   : > { %v1081_v17 = vpop.f32.mrb[13].mxu1 }
 0x3ff   : > { %4129 = vmatprep.mubr.msk.f32.mxu0 %vm620_vm1, %v1081_v17 }
 0x400   : > { %4130 = vmatmul.mubr.msk.f32.vlgmr.msra.gmra.mrb[12].mxu0 %vm620_vm1, %v4077_v16  ;;  %v3591_v16 = vld [vmem:[%s5630_s5 + $0x28] sm:$0xff] }
 0x401   : > { %4524 = vmatpush3.bf16.xpose.msk.msra.mxu0 %vm5082_vm2, %v4519_v11  ;;  %v4080_v18 = vpop.f32.mrb[14].mxu1  ;;  %v3590_v11 = vld [vmem:[%s5630_s5 + $0x20] sm:$0xff] }
 0x402   : > { %v1091_v20 = vpop.f32.mrb[15].mxu1  ;;  %v4533_v17 = vpack.c.bf16 %v3591_v16, %v3590_v11 }
 0x403   : > { %4136 = vmatprep.mubr.msk.f32.mxu0 %vm620_vm1, %v1091_v20 }
 0x408   : > { %4137 = vmatmul.mubr.msk.f32.vlgmr.msra.gmra.mrb[14].mxu0 %vm620_vm1, %v4080_v18 }
 0x40d   : > { %v4121_v5 = vpop.f32.mrb[16].mxu1 }
 0x40e   : > { %v1269_v6 = vpop.f32.mrb[17].mxu1 }
 0x40f   : > { %v4525_v7 = vpack.c.bf16 %v4121_v5, %v1269_v6 }
 0x411   : > { %4526 = vmatprep.subr.bf16.mxu0 %v4525_v7  ;;  %v4124_v8 = vpop.f32.mrb[18].mxu1 }
 0x412   : > { %4528 = vmatpush3.bf16.msra.mxu0 %v4525_v7  ;;  %v1279_v9 = vpop.f32.mrb[19].mxu1 }
 0x413   : > { %v4529_v10 = vpack.c.bf16 %v4124_v8, %v1279_v9  ;;  %4534 = vmatprep.subr.bf16.mxu0 %v4533_v17  ;;  %v3614_v8 = vld [vmem:[%s5628_s3 + $0x80] sm:$0xff]  ;;  %v3615_v9 = vld [vmem:[%s5628_s3 + $0x88] sm:$0xff] }
 0x415   : > { %4530 = vmatprep.subr.bf16.mxu1 %v4529_v10 }
 0x416   : > { %4532 = vmatpush3.bf16.msra.mxu1 %v4529_v10  ;;  %v4565_v10 = vpack.c.bf16 %v3615_v9, %v3614_v8 }
 0x4d3   : > { %v4131_v41 = vpop.f32.mrb[12].mxu0 }
 0x4d4   : > { %v1366_v42 = vpop.f32.mrb[13].mxu0  ;;  %v1465_v43 = vsel %vm795_vm3, %v4131_v41, -inf }
 0x4d5   : > { %1466 = vmax.xlane.f32.xlu1 %v1465_v43  ;;  %v1462_v44 = vsel %vm795_vm3, %v1366_v42, -inf  ;;  %v1003_v43 = vld [vmem:[%s5630_s5 + $0x8] sm:$0xff] }
 0x4d6   : > { %1463 = vmax.xlane.f32.xlu0 %v1462_v44 }
 0x4db   : > { %v4138_v45 = vpop.f32.mrb[14].mxu0 }
 0x4dc   : > { %v1453_v46 = vpop.f32.mrb[15].mxu0  ;;  %v1471_v47 = vsel %vm795_vm3, %v4138_v45, -inf }
 0x4dd   : > { %1472 = vmax.xlane.f32.xlu1 %v1471_v47  ;;  %v1468_v48 = vsel %vm795_vm3, %v1453_v46, -inf }
 0x4de   : > { %1469 = vmax.xlane.f32.xlu0 %v1468_v48  ;;  %v3604_v48 = vld [vmem:[%s5627_s2 + $0x90] sm:$0xff] }
 0x562   : > { %v1467_v49 = vpop.xlane.xlu1 %1466 }
 0x563   : > { %v1475_v50 = vsub.f32 %v4131_v41, %v1467_v49  ;;  %v1464_v51 = vpop.xlane.xlu0 %1463  ;;  %v3605_v49 = vld [vmem:[%s5627_s2 + $0x98] sm:$0xff] }
 0x564   : > { %v1474_v52 = vsub.f32 %v1366_v42, %v1464_v51  ;;  %v1002_v42 = vld [vmem:[%s5630_s5] sm:$0xff] }
 0x565   : > { %v1480_v53 = vmul.f32 1.442695, %v1475_v50  ;;  %v4541_v44 = vpack.c.bf16 %v1003_v43, %v1002_v42  ;;  %v4553_v50 = vpack.c.bf16 %v3605_v49, %v3604_v48  ;;  %v3606_v51 = vld [vmem:[%s5627_s2 + $0xa0] sm:$0xff] }
 0x566   : > { %v1478_v54 = vmul.f32 1.442695, %v1474_v52  ;;  %v3607_v52 = vld [vmem:[%s5627_s2 + $0xa8] sm:$0xff] }
 0x567   : > { %4770 = vpow2.f32 %v1480_v53  ;;  %v4557_v53 = vpack.c.bf16 %v3607_v52, %v3606_v51 }
 0x568   : > { %4772 = vpow2.f32 %v1478_v54  ;;  %v3608_v54 = vld [vmem:[%s5627_s2 + $0xb0] sm:$0xff] }
 0x56a   : > { %v1473_v55 = vpop.xlane.xlu1 %1472 }
 0x56b   : > { %v1477_v56 = vsub.f32 %v4138_v45, %v1473_v55  ;;  %v1470_v57 = vpop.xlane.xlu0 %1469  ;;  %v3602_v45 = vld [vmem:[%s5627_s2 + $0x80] sm:$0xff]  ;;  %v3609_v55 = vld [vmem:[%s5627_s2 + $0xb8] sm:$0xff] }
 0x56c   : > { %v1476_v58 = vsub.f32 %v1453_v46, %v1470_v57  ;;  %v3603_v46 = vld [vmem:[%s5627_s2 + $0x88] sm:$0xff]  ;;  %v3626_v57 = vld [vmem:[%s5629_s4 + $0x80] sm:$0xff] }
 0x56d   : > { %v1484_v59 = vmul.f32 1.442695, %v1477_v56  ;;  %v4549_v47 = vpack.c.bf16 %v3603_v46, %v3602_v45  ;;  %v4561_v56 = vpack.c.bf16 %v3609_v55, %v3608_v54 }
 0x56e   : > { %v1482_v60 = vmul.f32 1.442695, %v1476_v58  ;;  %v3627_v58 = vld [vmem:[%s5629_s4 + $0x88] sm:$0xff] }
 0x56f   : > { %4774 = vpow2.f32 %v1484_v59  ;;  %4550 = vmatprep.subr.bf16.mxu1 %v4549_v47  ;;  %v3628_v59 = vld [vmem:[%s5629_s4 + $0x90] sm:$0xff] }
 0x570   : > { %4776 = vpow2.f32 %v1482_v60  ;;  %v4581_v60 = vpack.c.bf16 %v3627_v58, %v3626_v57 }
 0x571   : > { %v4771_v61 = vpop.eup %4770 }
 0x572   : > { %v4773_v62 = vpop.eup %4772  ;;  %v1489_v63 = vsel %vm795_vm3, %v4771_v61, 0.0 }
 0x573   : > { %1490 = vadd.xlane.f32.xlu1 %v1489_v63  ;;  %v1486_v0 = vsel %vm795_vm3, %v4773_v62, 0.0  ;;  %v3630_v63 = vld [vmem:[%s5629_s4 + $0xa0] sm:$0xff] }
 0x574   : > { %1487 = vadd.xlane.f32.xlu0 %v1486_v0  ;;  %v3631_v0 = vld [vmem:[%s5629_s4 + $0xa8] sm:$0xff] }
 0x579   : > { %v4775_v1 = vpop.eup %4774 }
 0x57a   : > { %v4777_v2 = vpop.eup %4776  ;;  %v1495_v3 = vsel %vm795_vm3, %v4775_v1, 0.0 }
 0x57b   : > { %1496 = vadd.xlane.f32.xlu1 %v1495_v3  ;;  %v1492_v4 = vsel %vm795_vm3, %v4777_v2, 0.0  ;;  %v3633_v3 = vld [vmem:[%s5629_s4 + $0xb8] sm:$0xff] }
 0x57c   : > { %1493 = vadd.xlane.f32.xlu0 %v1492_v4  ;;  %v1005_v4 = vld [vmem:[%s5630_s5 + $0x18] sm:$0xff] }
 0x600   : > { %v1491_v18 = vpop.xlane.xlu1 %1490 }
 0x601   : > { %4778 = vrcp.f32 %v1491_v18  ;;  %v1488_v20 = vpop.xlane.xlu0 %1487  ;;  %v3617_v18 = vld [vmem:[%s5628_s3 + $0x98] sm:$0xff] }
 0x602   : > { %4780 = vrcp.f32 %v1488_v20 }
 0x608   : > { %v1497_v21 = vpop.xlane.xlu1 %1496 }
 0x609   : > { %4782 = vrcp.f32 %v1497_v21  ;;  %v1494_v22 = vpop.xlane.xlu0 %1493  ;;  %v3618_v21 = vld [vmem:[%s5628_s3 + $0xa0] sm:$0xff] }
 0x60a   : > { %4784 = vrcp.f32 %v1494_v22  ;;  %v3619_v22 = vld [vmem:[%s5628_s3 + $0xa8] sm:$0xff] }
 0x60b   : > { %v4779_v24 = vpop.eup %4778 }
 0x60c   : > { %v4781_v33 = vpop.eup %4780  ;;  %v1503_v36 = vmul.f32 %v4779_v24, %v4771_v61  ;;  %v3629_v61 = vld [vmem:[%s5629_s4 + $0x98] sm:$0xff]  ;;  %v4573_v24 = vpack.c.bf16 %v3619_v22, %v3618_v21 }
 0x60d   : > { %v1502_v35 = vmul.f32 %v4781_v33, %v4773_v62  ;;  %v4585_v62 = vpack.c.bf16 %v3629_v61, %v3628_v59 }
 0x60f   : > { %4143 = vmatprep.mubr.msk.f32.mxu0 %vm795_vm3, %v1502_v35 }
 0x610   : > { %4144 = vmatmul.mubr.msk.f32.vlgmr.msra.gmra.mrb[16].mxu0 %vm795_vm3, %v1503_v36 }
 0x611   : > { %4536 = vmatpush3.bf16.msra.mxu0 %v4533_v17  ;;  %v3616_v17 = vld [vmem:[%s5628_s3 + $0x90] sm:$0xff] }
 0x612   : > { %4538 = vmatprep.subr.bf16.mxu0 %v4537_v37  ;;  %v4569_v20 = vpack.c.bf16 %v3617_v18, %v3616_v17  ;;  %v3652_v17 = vld [vmem:[%s5630_s5 + $0x50] sm:$0xff]  ;;  %v3653_v18 = vld [vmem:[%s5630_s5 + $0x58] sm:$0xff] }
 0x613   : > { %v4783_v38 = vpop.eup %4782 }
 0x614   : > { %v4785_v39 = vpop.eup %4784  ;;  %v1505_v41 = vmul.f32 %v4783_v38, %v4775_v1  ;;  %v4589_v1 = vpack.c.bf16 %v3631_v0, %v3630_v63 }
 0x615   : > { %v1504_v40 = vmul.f32 %v4785_v39, %v4777_v2  ;;  %4540 = vmatpush3.bf16.msra.mxu0 %v4537_v37  ;;  %v3632_v2 = vld [vmem:[%s5629_s4 + $0xb0] sm:$0xff] }
 0x616   : > { %4542 = vmatprep.subr.bf16.mxu0 %v4541_v44 }
 0x617   : > { %4150 = vmatprep.mubr.msk.f32.mxu1 %vm795_vm3, %v1504_v40 }
 0x618   : > { %4151 = vmatmul.mubr.msk.f32.vlgmr.msra.gmra.mrb[20].mxu1 %vm795_vm3, %v1505_v41 }
 0x619   : > { %4197 = vmatprep.mubr.msk.f32.mxu1 %vm324_vm0, %v5044_v23  ;;  %4552 = vmatpush3.bf16.msra.mxu1 %v4549_v47 }
 0x61a   : > { %4554 = vmatprep.subr.bf16.mxu1 %v4553_v50 }
 0x61d   : > { %4556 = vmatpush3.bf16.msra.mxu1 %v4553_v50 }
 0x61e   : > { %4558 = vmatprep.subr.bf16.mxu1 %v4557_v53 }
 0x621   : > { %4560 = vmatpush3.bf16.msra.mxu1 %v4557_v53 }
 0x622   : > { %4562 = vmatprep.subr.bf16.mxu1 %v4561_v56 }
 0x625   : > { %4564 = vmatpush3.bf16.msra.mxu1 %v4561_v56 }
 0x626   : > { %4582 = vmatprep.subr.bf16.mxu1 %v4581_v60 }
 0x628   : > { %4198 = vmatmul.mubr.msk.f32.vlgmr.msra.gmra.mrb[22].mxu1 %vm324_vm0, %v5055_v28  ;;  %v4593_v28 = vpack.c.bf16 %v3633_v3, %v3632_v2 }
 0x629   : > { %4200 = vmatprep.mubr.msk.f32.mxu1 %vm324_vm0, %v5060_v29  ;;  %4584 = vmatpush3.bf16.msra.mxu1 %v4581_v60  ;;  %v1004_v29 = vld [vmem:[%s5630_s5 + $0x10] sm:$0xff] }
 0x62a   : > { %4586 = vmatprep.subr.bf16.mxu1 %v4585_v62  ;;  %v4545_v7 = vpack.c.bf16 %v1005_v4, %v1004_v29 }
 0x62c   : > { %4201 = vmatmul.mubr.msk.f32.gmra.mrb[24].mxu1 %vm324_vm0, %v5072_v31 }
 0x62d   : > { %4588 = vmatpush3.bf16.msra.mxu1 %v4585_v62  ;;  %4241 = vmatprep.mubr.msk.f32.mxu1 %vm324_vm0, %v5033_v19 }
 0x62e   : > { %4590 = vmatprep.subr.bf16.mxu1 %v4589_v1 }
 0x631   : > { %4592 = vmatpush3.bf16.msra.mxu1 %v4589_v1 }
 0x632   : > { %4594 = vmatprep.subr.bf16.mxu1 %v4593_v28 }
 0x635   : > { %4596 = vmatpush3.bf16.msra.mxu1 %v4593_v28 }
 0x638   : > { %4242 = vmatmul.mubr.msk.f32.vlgmr.msra.gmra.mrb[26].mxu1 %vm324_vm0, %v5049_v26 }
 0x639   : > { %4244 = vmatprep.mubr.msk.f32.mxu1 %vm324_vm0, %v5052_v27 }
 0x63c   : > { %4245 = vmatmul.mubr.msk.f32.gmra.mrb[28].mxu1 %vm324_vm0, %v5065_v30 }
 0x6e3   : > { %v4145_v5 = vpop.f32.mrb[16].mxu0 }
 0x6e4   : > { %v1578_v6 = vpop.f32.mrb[17].mxu0 }
 0x6e5   : > { %4161 = vmatprep.mubr.msk.f32.mxu0 %vm620_vm1, %v1578_v6  ;;  %v3651_v6 = vld [vmem:[%s5630_s5 + $0x48] sm:$0xff] }
 0x6e6   : > { %4162 = vmatmul.mubr.msk.f32.vlgmr.msra.gmra.mrb[18].mxu0 %vm620_vm1, %v4145_v5  ;;  %v3650_v5 = vld [vmem:[%s5630_s5 + $0x40] sm:$0xff] }
 0x6e7   : > { %4544 = vmatpush3.bf16.msra.mxu0 %v4541_v44 }
 0x6e8   : > { %4546 = vmatprep.subr.bf16.mxu0 %v4545_v7 }
 0x6eb   : > { %v4152_v11 = vpop.f32.mrb[20].mxu1  ;;  %4548 = vmatpush3.bf16.msra.mxu0 %v4545_v7  ;;  %v4617_v7 = vpack.c.bf16 %v3651_v6, %v3650_v5  ;;  %v3683_v5 = vld [vmem:[%s5629_s4 + $0xc8] sm:$0xff]  ;;  %v3684_v6 = vld [vmem:[%s5629_s4 + $0xd0] sm:$0xff] }
 0x6ec   : > { %v1659_v16 = vpop.f32.mrb[21].mxu1  ;;  %4566 = vmatprep.subr.bf16.mxu0 %v4565_v10 }
 0x6ed   : > { %4164 = vmatprep.mubr.msk.f32.mxu0 %vm620_vm1, %v1659_v16 }
 0x6ee   : > { %4165 = vmatmul.mubr.msk.f32.gmra.mrb[20].mxu0 %vm620_vm1, %v4152_v11 }
 0x6ef   : > { %4175 = vmatprep.mubr.msk.f32.mxu0 %vm620_vm1, %v5214_v13  ;;  %v3620_v13 = vld [vmem:[%s5628_s3 + $0xb0] sm:$0xff] }
 0x6f2   : > { %4176 = vmatmul.mubr.msk.f32.vlgmr.msra.gmra.mrb[18].mxu0 %vm620_vm1, %v5212_v12  ;;  %v4577_v12 = vpack.c.bf16 %v3621_v25, %v3620_v13 }
 0x6f3   : > { %4568 = vmatpush3.bf16.msra.mxu0 %v4565_v10  ;;  %4178 = vmatprep.mubr.msk.f32.mxu0 %vm620_vm1, %v5218_v15 }
 0x6f4   : > { %4570 = vmatprep.subr.bf16.mxu0 %v4569_v20 }
 0x6f6   : > { %4179 = vmatmul.mubr.msk.f32.gmra.mrb[20].mxu0 %vm620_vm1, %v5216_v14 }
 0x6f7   : > { %4572 = vmatpush3.bf16.msra.mxu0 %v4569_v20  ;;  %4219 = vmatprep.mubr.msk.f32.mxu0 %vm324_vm0, %v5033_v19 }
 0x6f8   : > { %4574 = vmatprep.subr.bf16.mxu0 %v4573_v24 }
 0x6fb   : > { %4576 = vmatpush3.bf16.msra.mxu0 %v4573_v24  ;;  %v4199_v15 = vpop.f32.mrb[22].mxu1  ;;  %v4621_v24 = vpack.c.bf16 %v3653_v18, %v3652_v17  ;;  %v3689_v17 = vld [vmem:[%s5629_s4 + $0xf8] sm:$0xff] }
 0x6fc   : > { %4578 = vmatprep.subr.bf16.mxu0 %v4577_v12  ;;  %v1942_v14 = vpop.f32.mrb[23].mxu1 }
 0x6ff   : > { %4580 = vmatpush3.bf16.msra.mxu0 %v4577_v12  ;;  %v4202_v32 = vpop.f32.mrb[24].mxu1 }
 0x700   : > { %v1952_v19 = vpop.f32.mrb[25].mxu1 }
 0x701   : > { %4258 = vmatprep.mubr.msk.f32.mxu1 %vm620_vm1, %v1952_v19 }
 0x702   : > { %4220 = vmatmul.mubr.msk.f32.vlgmr.msra.gmra.mrb[22].mxu0 %vm324_vm0, %v5049_v26 }
 0x703   : > { %4222 = vmatprep.mubr.msk.f32.mxu0 %vm324_vm0, %v5052_v27 }
 0x706   : > { %4223 = vmatmul.mubr.msk.f32.gmra.mrb[24].mxu0 %vm324_vm0, %v5065_v30 }
 0x707   : > { %4251 = vmatprep.mubr.msk.f32.mxu0 %vm620_vm1, %v1942_v14  ;;  %v3670_v14 = vld [vmem:[%s5628_s3 + $0xc0] sm:$0xff] }
 0x70b   : > { %v4243_v33 = vpop.f32.mrb[26].mxu1 }
 0x70c   : > { %v2130_v30 = vpop.f32.mrb[27].mxu1 }
 0x70d   : > { %v4609_v39 = vpack.c.bf16 %v4243_v33, %v2130_v30  ;;  %v3658_v33 = vld [vmem:[%s5627_s2 + $0xc0] sm:$0xff] }
 0x70f   : > { %v4246_v40 = vpop.f32.mrb[28].mxu1 }
 0x710   : > { %v2140_v41 = vpop.f32.mrb[29].mxu1 }
 0x711   : > { %v4613_v42 = vpack.c.bf16 %v4246_v40, %v2140_v41  ;;  %v3665_v40 = vld [vmem:[%s5627_s2 + $0xf8] sm:$0xff] }
 0x7d5   : > { %v4221_v35 = vpop.f32.mrb[22].mxu0 }
 0x7d6   : > { %v2036_v36 = vpop.f32.mrb[23].mxu0 }
 0x7d7   : > { %v4597_v37 = vpack.c.bf16 %v4221_v35, %v2036_v36  ;;  %v3659_v35 = vld [vmem:[%s5627_s2 + $0xc8] sm:$0xff] }
 0x7d8   : > { %v4625_v36 = vpack.c.bf16 %v3659_v35, %v3658_v33 }
 0x7d9   : > { %v4224_v38 = vpop.f32.mrb[24].mxu0  ;;  %4599 = vmatprep.subr.msk.bf16.mxu0 %vm5082_vm2, %v4597_v37 }
 0x7da   : > { %v2046_v26 = vpop.f32.mrb[25].mxu0  ;;  %4602 = vmatpush3.bf16.xpose.msk.msra.mxu0 %vm5082_vm2, %v4597_v37  ;;  %v3661_v37 = vld [vmem:[%s5627_s2 + $0xd8] sm:$0xff] }
 0x7db   : > { %v4603_v27 = vpack.c.bf16 %v4224_v38, %v2046_v26  ;;  %4610 = vmatprep.subr.bf16.mxu0 %v4609_v39  ;;  %v3662_v26 = vld [vmem:[%s5627_s2 + $0xe0] sm:$0xff] }
 0x7dd   : > { %4605 = vmatprep.subr.msk.bf16.mxu1 %vm5082_vm2, %v4603_v27 }
 0x7de   : > { %4608 = vmatpush3.bf16.xpose.msk.msra.mxu1 %vm5082_vm2, %v4603_v27  ;;  %v3663_v27 = vld [vmem:[%s5627_s2 + $0xe8] sm:$0xff] }
 0x7df   : > { %4614 = vmatprep.subr.bf16.mxu1 %v4613_v42  ;;  %v4633_v30 = vpack.c.bf16 %v3663_v27, %v3662_v26 }
 0x7e1   : > { %4252 = vmatmul.mubr.msk.f32.vlgmr.msra.gmra.mrb[26].mxu0 %vm620_vm1, %v4199_v15 }
 0x7e2   : > { %4612 = vmatpush3.bf16.msra.mxu0 %v4609_v39  ;;  %v3664_v39 = vld [vmem:[%s5627_s2 + $0xf0] sm:$0xff] }
 0x7e3   : > { %4618 = vmatprep.subr.bf16.mxu0 %v4617_v7  ;;  %v4637_v41 = vpack.c.bf16 %v3665_v40, %v3664_v39 }
 0x7e5   : > { %4259 = vmatmul.mubr.msk.f32.vlgmr.msra.gmra.mrb[30].mxu1 %vm620_vm1, %v4202_v32  ;;  %v3671_v32 = vld [vmem:[%s5628_s3 + $0xc8] sm:$0xff] }
 0x7e6   : > { %4616 = vmatpush3.bf16.msra.mxu1 %v4613_v42  ;;  %v4641_v19 = vpack.c.bf16 %v3671_v32, %v3670_v14  ;;  %v4818_v42 = vld [vmem:[%s5030_s19 + $0x8] sm:$0xff] }
 0x7e7   : > { %4626 = vmatprep.subr.bf16.mxu1 %v4625_v36 }
 0x8b4   : > { %v4253_v43 = vpop.f32.mrb[26].mxu0 }
 0x8b5   : > { %v2227_v44 = vpop.f32.mrb[27].mxu0  ;;  %v2326_v45 = vsel %vm795_vm3, %v4253_v43, -inf }
 0x8b6   : > { %2327 = vmax.xlane.f32.xlu1 %v2326_v45  ;;  %v2323_v46 = vsel %vm795_vm3, %v2227_v44, -inf  ;;  %v3672_v45 = vld [vmem:[%s5628_s3 + $0xd0] sm:$0xff] }
 0x8b7   : > { %2324 = vmax.xlane.f32.xlu0 %v2323_v46  ;;  %v3673_v46 = vld [vmem:[%s5628_s3 + $0xd8] sm:$0xff] }
 0x8b8   : > { %v4260_v47 = vpop.f32.mrb[30].mxu1 }
 0x8b9   : > { %v2314_v48 = vpop.f32.mrb[31].mxu1  ;;  %v2332_v49 = vsel %vm795_vm3, %v4260_v47, -inf }
 0x8ba   : > { %2333 = vmax.xlane.f32.xlu1 %v2332_v49  ;;  %v2329_v50 = vsel %vm795_vm3, %v2314_v48, -inf  ;;  %v4645_v49 = vpack.c.bf16 %v3673_v46, %v3672_v45 }
 0x8bb   : > { %2330 = vmax.xlane.f32.xlu0 %v2329_v50  ;;  %v3675_v50 = vld [vmem:[%s5628_s3 + $0xe8] sm:$0xff] }
 0x943   : > { %v2328_v51 = vpop.xlane.xlu1 %2327 }
 0x944   : > { %v2336_v52 = vsub.f32 %v4253_v43, %v2328_v51  ;;  %v2325_v53 = vpop.xlane.xlu0 %2324  ;;  %v4819_v43 = vld [vmem:[%s5030_s19 + $0x10] sm:$0xff]  ;;  %s5584_s19 = scalar_lea.sflag [#allocation3], %s290_s21 }
 0x945   : > { %v2335_v54 = vsub.f32 %v2227_v44, %v2325_v53  ;;  %v4820_v44 = vld [vmem:[%s5025_s18] sm:$0xff] }
 0x946   : > { %v2341_v55 = vmul.f32 1.442695, %v2336_v52 }
 0x947   : > { %v2339_v56 = vmul.f32 1.442695, %v2335_v54  ;;  %v2334_v57 = vpop.xlane.xlu1 %2333  ;;  %v3676_v54 = vld [vmem:[%s5628_s3 + $0xf0] sm:$0xff] }
 0x948   : > { %4786 = vpow2.f32 %v2341_v55  ;;  %v2338_v58 = vsub.f32 %v4260_v47, %v2334_v57  ;;  %v2331_v59 = vpop.xlane.xlu0 %2330  ;;  %v3677_v55 = vld [vmem:[%s5628_s3 + $0xf8] sm:$0xff]  ;;  %v4821_v57 = vld [vmem:[%s5025_s18 + $0x8] sm:$0xff] }
 0x949   : > { %4788 = vpow2.f32 %v2339_v56  ;;  %v2337_v60 = vsub.f32 %v2314_v48, %v2331_v59  ;;  %v4653_v56 = vpack.c.bf16 %v3677_v55, %v3676_v54  ;;  %v4823_v59 = vld [vmem:[%s5025_s18 + $0x18] sm:$0xff] }
 0x94a   : > { %v2345_v61 = vmul.f32 1.442695, %v2338_v58  ;;  %v4822_v58 = vld [vmem:[%s5025_s18 + $0x10] sm:$0xff]  ;;  %s292_s18 = scalar_lea.vmem [#allocation2], %s3511_s22 }
 0x94b   : > { %v2343_v62 = vmul.f32 1.442695, %v2337_v60  ;;  %s3433_s9 = sshll.u32 %s292_s18, 4  ;;  %s5577_s9 = int_to_ptr.vmem [resolvable:$true] %s3433_s9 }
 0x94c   : > { %4790 = vpow2.f32 %v2345_v61  ;;  %s4824_s16 = scalar_lea.vmem %s5577_s9, 512  ;;  %p4831_p0 = scmp.lt.s32.totalorder %s5577_s9, %s4829_s17 }
 0x94d   : > { %4792 = vpow2.f32 %v2343_v62  ;;  %p4825_p11 = scmp.ne.s32.totalorder %s5577_s9, %s4824_s16  ;;  %p4832_p1 = scmp.lt.s32.totalorder %s4830_s20, %s4824_s16 }
 0x94f   : > { %p4826_p12 = pnand %p4825_p11, %p4969_p5  ;;  %p4833_p2 = por %p4832_p1, %p4831_p0 }
 0x951   : > { %p4827_p13 = pneg %p4826_p12 }
 0x952   : > { %v4787_v63 = vpop.eup %4786 }
 0x953   : > { %v4789_v0 = vpop.eup %4788  ;;  %v2350_v1 = vsel %vm795_vm3, %v4787_v63, 0.0  ;;  %p4834_p3 = pnand %p4833_p2, %p4827_p13 }
 0x954   : > { %2351 = vadd.xlane.f32.xlu1 %v2350_v1  ;;  %v2347_v2 = vsel %vm795_vm3, %v4789_v0, 0.0 }
 0x955   : > { %2348 = vadd.xlane.f32.xlu0 %v2347_v2 }
 0x956   : > { %v4791_v3 = vpop.eup %4790 }
 0x957   : > { %v4793_v28 = vpop.eup %4792  ;;  %v2356_v29 = vsel %vm795_vm3, %v4791_v3, 0.0 }
 0x958   : > { %2357 = vadd.xlane.f32.xlu1 %v2356_v29  ;;  %v2353_v4 = vsel %vm795_vm3, %v4793_v28, 0.0 }
 0x959   : > { %2354 = vadd.xlane.f32.xlu0 %v2353_v4  ;;  %v3682_v4 = vld [vmem:[%s5629_s4 + $0xc0] sm:$0xff] }
 0x9e1   : > { %v2352_v8 = vpop.xlane.xlu1 %2351 }
 0x9e2   : > { %4794 = vrcp.f32 %v2352_v8  ;;  %v2349_v9 = vpop.xlane.xlu0 %2348  ;;  %v4661_v8 = vpack.c.bf16 %v3685_v34, %v3684_v6  ;;  %v3714_v34 = vld [vmem:[%s5631_s6] ss:$0 sm:$0xff] }
 0x9e3   : > { %4796 = vrcp.f32 %v2349_v9  ;;  %v3686_v9 = vld [vmem:[%s5629_s4 + $0xe0] sm:$0xff] }
 0x9e5   : > { %v2358_v10 = vpop.xlane.xlu1 %2357 }
 0x9e6   : > { %4798 = vrcp.f32 %v2358_v10  ;;  %v2355_v11 = vpop.xlane.xlu0 %2354  ;;  %v3687_v10 = vld [vmem:[%s5629_s4 + $0xe8] sm:$0xff] }
 0x9e7   : > { %4800 = vrcp.f32 %v2355_v11  ;;  %v4665_v11 = vpack.c.bf16 %v3687_v10, %v3686_v9 }
 0x9ec   : > { %v4795_v16 = vpop.eup %4794 }
 0x9ed   : > { %v4797_v20 = vpop.eup %4796  ;;  %v2364_v22 = vmul.f32 %v4795_v16, %v4787_v63  ;;  %v3688_v16 = vld [vmem:[%s5629_s4 + $0xf0] sm:$0xff] }
 0x9ee   : > { %v2363_v21 = vmul.f32 %v4797_v20, %v4789_v0  ;;  %v4669_v18 = vpack.c.bf16 %v3689_v17, %v3688_v16 }
 0x9f0   : > { %v4799_v13 = vpop.eup %4798  ;;  %4265 = vmatprep.mubr.msk.f32.mxu0 %vm795_vm3, %v2363_v21 }
 0x9f1   : > { %v4801_v25 = vpop.eup %4800  ;;  %4266 = vmatmul.mubr.msk.f32.vlgmr.msra.gmra.mrb[28].mxu0 %vm795_vm3, %v2364_v22  ;;  %v2366_v15 = vmul.f32 %v4799_v13, %v4791_v3 }
 0x9f2   : > { %v2365_v12 = vmul.f32 %v4801_v25, %v4793_v28  ;;  %4620 = vmatpush3.bf16.msra.mxu0 %v4617_v7  ;;  %v4657_v7 = vpack.c.bf16 %v3683_v5, %v3682_v4 }
 0x9f3   : > { %4622 = vmatprep.subr.bf16.mxu0 %v4621_v24 }
 0x9f4   : > { %4272 = vmatprep.mubr.msk.f32.mxu1 %vm795_vm3, %v2365_v12 }
 0x9f5   : > { %4273 = vmatmul.mubr.msk.f32.vlgmr.msra.gmra.mrb[32].mxu1 %vm795_vm3, %v2366_v15 }
 0x9f6   : > { %4624 = vmatpush3.bf16.msra.mxu0 %v4621_v24  ;;  %4305 = vmatprep.mubr.msk.f32.mxu1 %vm324_vm0, %v5044_v23  ;;  %v3660_v23 = vld [vmem:[%s5627_s2 + $0xd0] sm:$0xff] }
 0x9f7   : > { %4642 = vmatprep.subr.bf16.mxu0 %v4641_v19  ;;  %4628 = vmatpush3.bf16.msra.mxu1 %v4625_v36  ;;  %v4629_v38 = vpack.c.bf16 %v3661_v37, %v3660_v23 }
 0x9f9   : > { %4630 = vmatprep.subr.bf16.mxu1 %v4629_v38 }
 0x9fb   : > { %4632 = vmatpush3.bf16.msra.mxu1 %v4629_v38 }
 0x9fc   : > { %4634 = vmatprep.subr.bf16.mxu1 %v4633_v30 }
 0x9ff   : > { %4636 = vmatpush3.bf16.msra.mxu1 %v4633_v30 }
 0xa00   : > { %4638 = vmatprep.subr.bf16.mxu1 %v4637_v41 }
 0xa03   : > { %4640 = vmatpush3.bf16.msra.mxu1 %v4637_v41 }
 0xa04   : > { %4658 = vmatprep.subr.bf16.mxu1 %v4657_v7 }
 0xa06   : > { %4306 = vmatmul.mubr.msk.f32.vlgmr.msra.gmra.mrb[34].mxu1 %vm324_vm0, %v4818_v42 }
 0xa07   : > { %4308 = vmatprep.mubr.msk.f32.mxu1 %vm324_vm0, %v4819_v43  ;;  %4660 = vmatpush3.bf16.msra.mxu1 %v4657_v7 }
 0xa08   : > { %4662 = vmatprep.subr.bf16.mxu1 %v4661_v8 }
 0xa0a   : > { %4309 = vmatmul.mubr.msk.f32.gmra.mrb[36].mxu1 %vm324_vm0, %v5072_v31  ;;  %v3674_v31 = vld [vmem:[%s5628_s3 + $0xe0] sm:$0xff] }
 0xa0b   : > { %4349 = vmatprep.mubr.msk.f32.mxu1 %vm324_vm0, %v4820_v44  ;;  %v4649_v53 = vpack.c.bf16 %v3675_v50, %v3674_v31  ;;  %4664 = vmatpush3.bf16.msra.mxu1 %v4661_v8 }
 0xa0c   : > { %4666 = vmatprep.subr.bf16.mxu1 %v4665_v11 }
 0xa0f   : > { %4668 = vmatpush3.bf16.msra.mxu1 %v4665_v11 }
 0xa10   : > { %4670 = vmatprep.subr.bf16.mxu1 %v4669_v18 }
 0xa13   : > { %4672 = vmatpush3.bf16.msra.mxu1 %v4669_v18 }
 0xa16   : > { %4350 = vmatmul.mubr.msk.f32.vlgmr.msra.gmra.mrb[38].mxu1 %vm324_vm0, %v4821_v57 }
 0xa17   : > { %4352 = vmatprep.mubr.msk.f32.mxu1 %vm324_vm0, %v4822_v58 }
 0xa1a   : > { %4353 = vmatmul.mubr.msk.f32.gmra.mrb[40].mxu1 %vm324_vm0, %v4823_v59 }
 0xac4   : > { %v4267_v47 = vpop.f32.mrb[28].mxu0 }
 0xac5   : > { %v2439_v48 = vpop.f32.mrb[29].mxu0 }
 0xac6   : > { %4283 = vmatprep.mubr.msk.f32.mxu0 %vm620_vm1, %v2439_v48 }
 0xac7   : > { %4284 = vmatmul.mubr.msk.f32.vlgmr.msra.gmra.mrb[18].mxu0 %vm620_vm1, %v4267_v47 }
 0xac8   : > { %4644 = vmatpush3.bf16.msra.mxu0 %v4641_v19  ;;  %v4274_v51 = vpop.f32.mrb[32].mxu1 }
 0xac9   : > { %v2520_v52 = vpop.f32.mrb[33].mxu1  ;;  %4646 = vmatprep.subr.bf16.mxu0 %v4645_v49 }
 0xaca   : > { %4286 = vmatprep.mubr.msk.f32.mxu0 %vm620_vm1, %v2520_v52  ;;  %v3706_v52 = vld [vmem:[%s5630_s5 + $0x60] sm:$0xff] }
 0xacb   : > { %4287 = vmatmul.mubr.msk.f32.gmra.mrb[20].mxu0 %vm620_vm1, %v4274_v51 }
 0xacc   : > { %4648 = vmatpush3.bf16.msra.mxu0 %v4645_v49  ;;  %4327 = vmatprep.mubr.msk.f32.mxu0 %vm324_vm0, %v4820_v44 }
 0xacd   : > { %4650 = vmatprep.subr.bf16.mxu0 %v4649_v53 }
 0xad0   : > { %4652 = vmatpush3.bf16.msra.mxu0 %v4649_v53  ;;  %v3707_v53 = vld [vmem:[%s5630_s5 + $0x68] sm:$0xff] }
 0xad1   : > { %4654 = vmatprep.subr.bf16.mxu0 %v4653_v56  ;;  %v4693_v54 = vpack.c.bf16 %v3707_v53, %v3706_v52 }
 0xad4   : > { %4656 = vmatpush3.bf16.msra.mxu0 %v4653_v56 }
 0xad7   : > { %4328 = vmatmul.mubr.msk.f32.vlgmr.msra.gmra.mrb[30].mxu0 %vm324_vm0, %v4821_v57 }
 0xad8   : > { %4330 = vmatprep.mubr.msk.f32.mxu0 %vm324_vm0, %v4822_v58 }
 0xad9   : > { %v4307_v60 = vpop.f32.mrb[34].mxu1 }
 0xada   : > { %v2710_v61 = vpop.f32.mrb[35].mxu1 }
 0xadb   : > { %4331 = vmatmul.mubr.msk.f32.gmra.mrb[32].mxu0 %vm324_vm0, %v4823_v59 }
 0xadc   : > { %4359 = vmatprep.mubr.msk.f32.mxu0 %vm620_vm1, %v2710_v61 }
 0xadd   : > { %v4310_v62 = vpop.f32.mrb[36].mxu1 }
 0xade   : > { %v2720_v63 = vpop.f32.mrb[37].mxu1 }
 0xae9   : > { %v4351_v47 = vpop.f32.mrb[38].mxu1 }
 0xaea   : > { %v2898_v48 = vpop.f32.mrb[39].mxu1 }
 0xaeb   : > { %v4685_v49 = vpack.c.bf16 %v4351_v47, %v2898_v48 }
 0xaed   : > { %4686 = vmatprep.subr.bf16.mxu1 %v4685_v49  ;;  %v4354_v31 = vpop.f32.mrb[40].mxu1 }
 0xaee   : > { %4688 = vmatpush3.bf16.msra.mxu1 %v4685_v49  ;;  %v2908_v50 = vpop.f32.mrb[41].mxu1 }
 0xaef   : > { %v4689_v51 = vpack.c.bf16 %v4354_v31, %v2908_v50 }
 0xbaa   : > { %v4329_v0 = vpop.f32.mrb[30].mxu0 }
 0xbab   : > { %v2804_v1 = vpop.f32.mrb[31].mxu0 }
 0xbac   : > { %v4673_v2 = vpack.c.bf16 %v4329_v0, %v2804_v1  ;;  %v3708_v0 = vld [vmem:[%s5630_s5 + $0x70] sm:$0xff]  ;;  %v3709_v1 = vld [vmem:[%s5630_s5 + $0x78] sm:$0xff] }
 0xbae   : > { %4675 = vmatprep.subr.msk.bf16.mxu0 %vm5082_vm2, %v4673_v2  ;;  %v4332_v3 = vpop.f32.mrb[32].mxu0 }
 0xbaf   : > { %4678 = vmatpush3.bf16.xpose.msk.msra.mxu0 %vm5082_vm2, %v4673_v2  ;;  %v2814_v28 = vpop.f32.mrb[33].mxu0 }
 0xbb0   : > { %v4679_v29 = vpack.c.bf16 %v4332_v3, %v2814_v28 }
 0xbb2   : > { %4681 = vmatprep.subr.msk.bf16.mxu0 %vm5082_vm2, %v4679_v29 }
 0xbb6   : > { %4360 = vmatmul.mubr.msk.f32.vlgmr.msra.gmra.mrb[34].mxu0 %vm620_vm1, %v4307_v60 }
 0xbb7   : > { %4684 = vmatpush3.bf16.xpose.msk.msra.mxu0 %vm5082_vm2, %v4679_v29  ;;  %4366 = vmatprep.mubr.msk.f32.mxu0 %vm620_vm1, %v2720_v63  ;;  %v4697_v29 = vpack.c.bf16 %v3709_v1, %v3708_v0 }
 0xbb8   : > { %4690 = vmatprep.subr.bf16.mxu0 %v4689_v51 }
 0xbbe   : > { %4367 = vmatmul.mubr.msk.f32.vlgmr.msra.gmra.mrb[36].mxu0 %vm620_vm1, %v4310_v62 }
 0xbbf   : > { %4692 = vmatpush3.bf16.msra.mxu0 %v4689_v51 }
 0xbc0   : > { %4694 = vmatprep.subr.bf16.mxu0 %v4693_v54 }
 0xc89   : > { %v4361_v20 = vpop.f32.mrb[34].mxu0 }
 0xc8a   : > { %v2995_v21 = vpop.f32.mrb[35].mxu0  ;;  %v3094_v22 = vsel %vm795_vm3, %v4361_v20, -inf }
 0xc8b   : > { %3095 = vmax.xlane.f32.xlu1 %v3094_v22  ;;  %v3091_v24 = vsel %vm795_vm3, %v2995_v21, -inf }
 0xc8c   : > { %3092 = vmax.xlane.f32.xlu0 %v3091_v24 }
 0xc91   : > { %v4368_v13 = vpop.f32.mrb[36].mxu0 }
 0xc92   : > { %v3082_v25 = vpop.f32.mrb[37].mxu0  ;;  %v3100_v12 = vsel %vm795_vm3, %v4368_v13, -inf }
 0xc93   : > { %3101 = vmax.xlane.f32.xlu1 %v3100_v12  ;;  %v3097_v15 = vsel %vm795_vm3, %v3082_v25, -inf }
 0xc94   : > { %3098 = vmax.xlane.f32.xlu0 %v3097_v15 }
 0xd18   : > { %v3096_v14 = vpop.xlane.xlu1 %3095 }
 0xd19   : > { %v3104_v32 = vsub.f32 %v4361_v20, %v3096_v14  ;;  %v3093_v19 = vpop.xlane.xlu0 %3092 }
 0xd1a   : > { %v3103_v33 = vsub.f32 %v2995_v21, %v3093_v19 }
 0xd1b   : > { %v3109_v35 = vmul.f32 1.442695, %v3104_v32 }
 0xd1c   : > { %v3107_v36 = vmul.f32 1.442695, %v3103_v33 }
 0xd1d   : > { %4802 = vpow2.f32 %v3109_v35 }
 0xd1e   : > { %4804 = vpow2.f32 %v3107_v36 }
 0xd20   : > { %v3102_v23 = vpop.xlane.xlu1 %3101 }
 0xd21   : > { %v3106_v37 = vsub.f32 %v4368_v13, %v3102_v23  ;;  %v3099_v38 = vpop.xlane.xlu0 %3098 }
 0xd22   : > { %v3105_v26 = vsub.f32 %v3082_v25, %v3099_v38 }
 0xd23   : > { %v3113_v27 = vmul.f32 1.442695, %v3106_v37 }
 0xd24   : > { %v3111_v30 = vmul.f32 1.442695, %v3105_v26 }
 0xd25   : > { %4806 = vpow2.f32 %v3113_v27 }
 0xd26   : > { %4808 = vpow2.f32 %v3111_v30 }
 0xd27   : > { %v4803_v39 = vpop.eup %4802 }
 0xd28   : > { %v4805_v40 = vpop.eup %4804  ;;  %v3118_v41 = vsel %vm795_vm3, %v4803_v39, 0.0 }
 0xd29   : > { %3119 = vadd.xlane.f32.xlu1 %v3118_v41  ;;  %v3115_v42 = vsel %vm795_vm3, %v4805_v40, 0.0 }
 0xd2a   : > { %3116 = vadd.xlane.f32.xlu0 %v3115_v42 }
 0xd2f   : > { %v4807_v43 = vpop.eup %4806 }
 0xd30   : > { %v4809_v44 = vpop.eup %4808  ;;  %v3124_v45 = vsel %vm795_vm3, %v4807_v43, 0.0 }
 0xd31   : > { %3125 = vadd.xlane.f32.xlu1 %v3124_v45  ;;  %v3121_v46 = vsel %vm795_vm3, %v4809_v44, 0.0 }
 0xd32   : > { %3122 = vadd.xlane.f32.xlu0 %v3121_v46 }
 0xdb6   : > { %v3120_v55 = vpop.xlane.xlu1 %3119 }
 0xdb7   : > { %4810 = vrcp.f32 %v3120_v55  ;;  %v3117_v56 = vpop.xlane.xlu0 %3116 }
 0xdb8   : > { %4812 = vrcp.f32 %v3117_v56 }
 0xdbe   : > { %v3126_v57 = vpop.xlane.xlu1 %3125 }
 0xdbf   : > { %4814 = vrcp.f32 %v3126_v57  ;;  %v3123_v58 = vpop.xlane.xlu0 %3122 }
 0xdc0   : > { %4816 = vrcp.f32 %v3123_v58 }
 0xdc1   : > { %v4811_v59 = vpop.eup %4810 }
 0xdc2   : > { %v4813_v60 = vpop.eup %4812  ;;  %v3132_v62 = vmul.f32 %v4811_v59, %v4803_v39 }
 0xdc3   : > { %v3131_v61 = vmul.f32 %v4813_v60, %v4805_v40 }
 0xdc5   : > { %4373 = vmatprep.mubr.msk.f32.mxu1 %vm795_vm3, %v3131_v61 }
 0xdc6   : > { %4374 = vmatmul.mubr.msk.f32.vlgmr.msra.gmra.mrb[42].mxu1 %vm795_vm3, %v3132_v62 }
 0xdc9   : > { %v4815_v63 = vpop.eup %4814 }
 0xdca   : > { %v4817_v2 = vpop.eup %4816  ;;  %v3134_v28 = vmul.f32 %v4815_v63, %v4807_v43 }
 0xdcb   : > { %v3133_v3 = vmul.f32 %v4817_v2, %v4809_v44 }
 0xdcd   : > { %4380 = vmatprep.mubr.msk.f32.mxu0 %vm795_vm3, %v3133_v3 }
 0xdce   : > { %4381 = vmatmul.mubr.msk.f32.vlgmr.msra.gmra.mrb[38].mxu0 %vm795_vm3, %v3134_v28 }
 0xdcf   : > { %4696 = vmatpush3.bf16.msra.mxu0 %v4693_v54 }
 0xdd0   : > { %4698 = vmatprep.subr.bf16.mxu0 %v4697_v29 }
 0xdd3   : > { %4700 = vmatpush3.bf16.msra.mxu0 %v4697_v29 }
 0xe99   : > { %v4375_v4 = vpop.f32.mrb[42].mxu1 }
 0xe9a   : > { %v3207_v5 = vpop.f32.mrb[43].mxu1 }
 0xe9b   : > { %4391 = vmatprep.mubr.msk.f32.mxu0 %vm620_vm1, %v3207_v5 }
 0xe9c   : > { %4392 = vmatmul.mubr.msk.f32.vlgmr.msra.gmra.mrb[18].mxu0 %vm620_vm1, %v4375_v4 }
 0xea1   : > { %v4382_v6 = vpop.f32.mrb[38].mxu0 }
 0xea2   : > { %v3288_v7 = vpop.f32.mrb[39].mxu0 }
 0xea3   : > { %4394 = vmatprep.mubr.msk.f32.mxu0 %vm620_vm1, %v3288_v7 }
 0xea4   : > { %4395 = vmatmul.mubr.msk.f32.gmra.mrb[20].mxu0 %vm620_vm1, %v4382_v6 }
 0xf6f   : > { %v4393_v8 = vpop.f32.mrb[18].mxu0 }
 0xf70   : > { %v3411_v9 = vadd.f32 %v4393_v8, %v3714_v34  ;;  %v3380_v10 = vpop.f32.mrb[19].mxu0 }
 0xf71   : > { %v3410_v11 = vadd.f32 %v3714_v34, %v3380_v10 }
 0xf72   : > { %3415 = vst [vmem:[%s292_s18 + $0x8] sm:$0xff] %v3411_v9 }
 0xf73   : > { %3414 = vst [vmem:[%s292_s18] sm:$0xff] %v3410_v11 }
 0xf77   : > { %v4396_v16 = vpop.f32.mrb[20].mxu0 }
 0xf78   : > { %v3413_v17 = vadd.f32 %v4396_v16, %v3714_v34  ;;  %v3390_v18 = vpop.f32.mrb[21].mxu0 }
 0xf79   : > { %v3412_v20 = vadd.f32 %v3714_v34, %v3390_v18 }
 0xf7a   : > { %3417 = vst [vmem:[%s292_s18 + $0x18] sm:$0xff] %v3413_v17 }
 0xf7b   : > { %3416 = vst [vmem:[%s292_s18 + $0x10] sm:$0xff] %v3412_v20 }
 0xf7c   : > { %4837 = shalt.err (!%p4834_p3)
}
 0xf7d   : > { %s4838_s21 = scalar_lea.hbm %s5582_s15, 512  ;;  %s4842_s29 = scalar_lea.hbm %s5632_s7, 1024 }
 0xf7e   : > { %p4839_p4 = scmp.ne.s32.totalorder %s5582_s15, %s4838_s21  ;;  %p4843_p9 = scmp.lt.u32.totalorder %s5582_s15, %s5632_s7 }
 0xf7f   : > { %p4844_p10 = scmp.lt.u32.totalorder %s4842_s29, %s4838_s21  ;;  %p4846_p12 = scmp.lt.u32.totalorder %s4838_s21, %s5582_s15 }
 0xf80   : > { %p4840_p7 = pnand %p4839_p4, %p4969_p5 }
 0xf81   : > { %p4845_p11 = por %p4844_p10, %p4843_p9 }
 0xf82   : > { %p4841_p8 = pneg %p4840_p7 }
 0xf83   : > { %p4847_p13 = por %p4846_p12, %p4845_p11 }
 0xf85   : > { %p4848_p0 = pnand %p4847_p13, %p4841_p8 }
 0xf87   : > { %4851 = shalt.err (!%p4848_p0)
}
 0xf88   : > { %s4889_s13 = smov 128   ;;  %s4890_s14 = smov 8  }
 0xf89   : > { %4713 = dma.vmem_to_hbm [thread:$0]  (%p4969_p5), %s5577_s9, 512, %s5582_s15, %s5584_s19, %s4889_s13, %s4889_s13, %s4890_s14  }
 0xf8a PF: > { %p4719_p1 = scmp.ge.s32.totalorder %s4886_s27, 2  ;;  %s3448_s16 = sand.u32 1, %s4874_s24  }
 0xf8b   : > { %s3449_s28 = scalar_lea.sflag [#allocation3], %s3448_s16 }
 0xf8c   : > { %p4716_p2 = pnand %p4719_p1, %p4973_p6 }
 0xf8e   : > { %4869 = dma.done.wait (!%p4716_p2), %s3449_s28, 512  }
 0xf8f   : > { %4871 = vsyncadd (!%p4716_p2), %s3449_s28, 4294966784  ;;  %p17_p3 = scmp.ge.s32.totalorder %s4956_s30, 4   ;;  %s5637_s24 = smov %s4878_s25 }
 0xf90   : > { %s5638_s25 = smov %s4882_s26  ;;  %s5639_s26 = smov %s4967_s10 }
 0xf91   : > { %s5640_s27 = smov %s4956_s30  ;;  %19 = sbr.rel (!%p17_p3) target bundleno = 3 (0x3), region = 98 }
 0xf98   :  { %3454 = vsyncpa [#allocation3], 1 }
 0xf99   :  { %3456 = vsyncpa [#allocation3 + $0x1], 1 }

</bundles_post_ra>
